<compile_context>
chip_gen: v5e
topology: v5e:2x2
jax: 0.10.0
libtpu: 0.0.40
codegen_flags: <defaults>
</compile_context>

<pallas_src>
import functools

import jax
import jax.numpy as jnp
import numpy as np
from jax.experimental import pallas as pl
from jax.experimental.pallas import tpu as pltpu

_VMEM_LIMIT = 48 * 1024 * 1024      # explicit; safely under v7x's 64 MiB physical VMEM
_RESIDENT_BYTES = 8 * 1024 * 1024   # per-operand cap for VMEM-resident (constant-index) blocks


# ---------------------------------------------------------------------------
# Kernels
# ---------------------------------------------------------------------------
def _xw_kernel(z_ref, w_ref, dinv_ref, xw_ref):
    # xw = dinv * (z @ W): one (row-tile, W-column-tile) per grid step.
    xw = jnp.dot(z_ref[...], w_ref[...], preferred_element_type=jnp.float32)
    xw_ref[...] = (dinv_ref[...] * xw).astype(xw_ref.dtype)


def _h_kernel(a_ref, xw_ref, b_ref, dinv_ref, h_ref, acc_ref, *, tk, xw_resident):
    # h = relu(dinv * (A_hat @ xw) + b); contraction K-tiled over A_hat columns.
    k = pl.program_id(1)

    @pl.when(k == 0)
    def _():
        acc_ref[...] = jnp.zeros_like(acc_ref)

    if xw_resident:
        # xw lives fully in VMEM with a constant block index; slice the K-tile in-kernel.
        xw_blk = xw_ref[pl.ds(pl.multiple_of(k * tk, tk), tk), :]
    else:
        xw_blk = xw_ref[...]
    acc_ref[...] += jnp.dot(a_ref[...], xw_blk, preferred_element_type=jnp.float32)

    @pl.when(k == pl.num_programs(1) - 1)
    def _():
        h = jnp.maximum(dinv_ref[...] * acc_ref[...] + b_ref[...], 0.0)
        # Padded rows have dinv == 0; force them to exactly zero in the padded h buffer.
        h_ref[...] = jnp.where(dinv_ref[...] > 0.0, h, 0.0).astype(h_ref.dtype)


def _sigmoid(logits, approx):
    if approx:
        # Keep both transcendentals on the EUP slot (vexp + approx vrcp); v5e-friendly.
        return pl.reciprocal(1.0 + jnp.exp(-logits), approx=True)
    return jax.nn.sigmoid(logits)


def _adj_sym_kernel(oi_ref, oj_ref, h_ref, out_ref, tile_ref, *, ts, approx):
    # grid = (num_upper_tri_pairs, 2).
    #   m == 0: compute sigmoid(h_i @ h_j^T), stash it, write it at block (i, j).
    #   m == 1: write the transposed stashed tile at block (j, i) (no recompute).
    p = pl.program_id(0)
    m = pl.program_id(1)

    @pl.when(m == 0)
    def _():
        i0 = pl.multiple_of(oi_ref[2 * p] * ts, ts)
        j0 = pl.multiple_of(oj_ref[2 * p] * ts, ts)
        hi = h_ref[pl.ds(i0, ts), :]
        hj = h_ref[pl.ds(j0, ts), :]
        logits = jax.lax.dot_general(
            hi, hj, dimension_numbers=(((1,), (1,)), ((), ())),
            preferred_element_type=jnp.float32)
        tile_ref[...] = _sigmoid(logits, approx)
        out_ref[...] = tile_ref[...]

    @pl.when(m == 1)
    def _():
        out_ref[...] = tile_ref[...].T


def _adj_full_kernel(hi_ref, hj_ref, out_ref, *, approx):
    # Fallback (h too large to keep VMEM-resident): plain 2-D output grid, hi/hj streamed.
    logits = jax.lax.dot_general(
        hi_ref[...], hj_ref[...], dimension_numbers=(((1,), (1,)), ((), ())),
        preferred_element_type=jnp.float32)
    out_ref[...] = _sigmoid(logits, approx)


# ---------------------------------------------------------------------------
# Plain-JAX glue: sparse edge_index -> dense A_hat and dinv
# ---------------------------------------------------------------------------
def adjacency_and_dinv(edge_index, num_nodes):
    """A_hat = A + I (A[dst, src] = 1) and dinv = deg^{-1/2}, matching GCNConv defaults.

    Note: explicit self loops in edge_index are double counted here (PyG's gcn_norm uses
    add_remaining_self_loops) and duplicate edges accumulate via scatter-add.
    """
    src, dst = edge_index[0], edge_index[1]
    a = jnp.zeros((num_nodes, num_nodes), jnp.float32).at[dst, src].add(1.0)
    a_hat = a + jnp.eye(num_nodes, dtype=jnp.float32)
    deg = a_hat.sum(axis=1)
    dinv = jnp.where(deg > 0, 1.0 / jnp.sqrt(deg), 0.0)
    return a_hat, dinv


# ---------------------------------------------------------------------------
# Wrapper
# ---------------------------------------------------------------------------
def _round_up(x, m):
    return (x + m - 1) // m * m


def _pick_tile(dim, prefs, min_tiles=1):
    # dim is always a multiple of 128.
    for t in prefs:
        if dim % t == 0 and dim // t >= min_tiles:
            return t
    return min(dim, 128)


@functools.partial(jax.jit, static_argnames=("compute_dtype",))
def adjacency_decoder(z, edge_index, weight, bias, *, compute_dtype=jnp.bfloat16):
    """relu(GCNConv(z, edge_index)) -> sigmoid(h @ h.T), as three Pallas TPU stages."""
    n, c = z.shape
    a_hat, dinv = adjacency_and_dinv(edge_index, n)
    # TODO(synk): for genuinely sparse graphs (E << N^2) replace the dense A_hat @ xw with a
    # scalar-prefetch CSR/gather aggregation kernel to cut stage-1 HBM bytes to O(E*C).

    # Pad to MXU / lane-friendly sizes (zero padding; padded h rows forced to exactly zero,
    # padded output rows/cols sliced off). Everything is under one jit so pad+cast fuse.
    n_p = _round_up(n, 128)
    c_p = _round_up(c, 128)
    elem = jnp.dtype(compute_dtype).itemsize

    a_p = jnp.pad(a_hat, ((0, n_p - n), (0, n_p - n))).astype(compute_dtype)   # exact 0/1 in bf16
    z_p = jnp.pad(z, ((0, n_p - n), (0, c_p - c))).astype(compute_dtype)
    w_p = jnp.pad(weight, ((0, c_p - c), (0, c_p - c))).astype(compute_dtype)
    b_p = jnp.pad(bias, (0, c_p - c)).reshape(1, c_p).astype(jnp.float32)
    dinv_p = jnp.pad(dinv, (0, n_p - n)).reshape(n_p, 1).astype(jnp.float32)

    # Tile sizes (>= 2 tiles along "parallel" axes so both v7x TensorCores get work).
    tm = _pick_tile(n_p, (256, 128), min_tiles=2)        # row tile, stages 0/1
    tk = _pick_tile(n_p, (512, 256, 128))                # contraction tile over A_hat columns
    tc = _pick_tile(c_p, (1024, 512, 256, 128))          # W output-column tile, stage 0
    ts = _pick_tile(n_p, (512, 256, 128), min_tiles=2)   # square output tile, stage 2

    # Residency guards (constant-index blocks are still double-buffered by default).
    # TODO(synk): pipeline_mode=pl.Buffered(1) on invariant-index operands would halve their
    # VMEM footprint on v7x; left out pending validation on the installed jax version.
    xw_resident = n_p * c_p * elem <= _RESIDENT_BYTES
    h_resident = n_p * c_p * elem <= _RESIDENT_BYTES

    # ---- Stage 0: xw = dinv * (z @ W)
    xw = pl.pallas_call(
        _xw_kernel,
        out_shape=jax.ShapeDtypeStruct((n_p, c_p), compute_dtype),
        grid=(n_p // tm, c_p // tc),
        in_specs=[
            pl.BlockSpec((tm, c_p), lambda i, j: (i, 0)),
            pl.BlockSpec((c_p, tc), lambda i, j: (0, j)),
            pl.BlockSpec((tm, 1), lambda i, j: (i, 0)),
        ],
        out_specs=pl.BlockSpec((tm, tc), lambda i, j: (i, j)),
        compiler_params=pltpu.CompilerParams(
            dimension_semantics=("parallel", "parallel"),
            vmem_limit_bytes=_VMEM_LIMIT),
        cost_estimate=pl.CostEstimate(
            flops=2 * n_p * c_p * c_p, transcendentals=0,
            bytes_accessed=(2 * n_p * c_p + c_p * c_p) * elem),
    )(z_p, w_p, dinv_p)

    # ---- Stage 1: h = relu(dinv * (A_hat @ xw) + b); reduction axis last, f32 accumulator,
    # xw kept fully VMEM-resident (constant block index) when it fits.
    xw_spec = (pl.BlockSpec((n_p, c_p), lambda i, k: (0, 0)) if xw_resident
               else pl.BlockSpec((tk, c_p), lambda i, k: (k, 0)))
    h = pl.pallas_call(
        functools.partial(_h_kernel, tk=tk, xw_resident=xw_resident),
        out_shape=jax.ShapeDtypeStruct((n_p, c_p), compute_dtype),
        grid=(n_p // tm, n_p // tk),
        in_specs=[
            pl.BlockSpec((tm, tk), lambda i, k: (i, k)),
            xw_spec,
            pl.BlockSpec((1, c_p), lambda i, k: (0, 0)),
            pl.BlockSpec((tm, 1), lambda i, k: (i, 0)),
        ],
        out_specs=pl.BlockSpec((tm, c_p), lambda i, k: (i, 0)),
        scratch_shapes=[pltpu.VMEM((tm, c_p), jnp.float32)],
        compiler_params=pltpu.CompilerParams(
            dimension_semantics=("parallel", "arbitrary"),
            vmem_limit_bytes=_VMEM_LIMIT),
        cost_estimate=pl.CostEstimate(
            flops=2 * n_p * n_p * c_p, transcendentals=0,
            bytes_accessed=(n_p * n_p + 2 * n_p * c_p) * elem),
    )(a_p, xw, b_p, dinv_p)

    approx = compute_dtype != jnp.float32

    # ---- Stage 2: out = sigmoid(h @ h^T)
    if h_resident:
        # Symmetric path: one matmul per upper-triangular tile pair; the lower triangle is the
        # XLU-transposed tile written via a scalar-prefetch index table. h is VMEM-resident.
        nt = n_p // ts
        pairs = [(i, j) for i in range(nt) for j in range(i, nt)]
        oi = np.array([blk for (i, j) in pairs for blk in (i, j)], dtype=np.int32)
        oj = np.array([blk for (i, j) in pairs for blk in (j, i)], dtype=np.int32)
        out_p = pl.pallas_call(
            functools.partial(_adj_sym_kernel, ts=ts, approx=approx),
            out_shape=jax.ShapeDtypeStruct((n_p, n_p), jnp.float32),
            grid_spec=pltpu.PrefetchScalarGridSpec(
                num_scalar_prefetch=2,
                grid=(len(pairs), 2),
                in_specs=[pl.BlockSpec((n_p, c_p), lambda p, m, oi, oj: (0, 0))],
                out_specs=pl.BlockSpec(
                    (ts, ts), lambda p, m, oi, oj: (oi[2 * p + m], oj[2 * p + m])),
                scratch_shapes=[pltpu.VMEM((ts, ts), jnp.float32)]),
            compiler_params=pltpu.CompilerParams(
                dimension_semantics=("parallel", "arbitrary"),
                vmem_limit_bytes=_VMEM_LIMIT),
            cost_estimate=pl.CostEstimate(
                flops=n_p * (n_p + ts) * c_p,
                transcendentals=n_p * (n_p + ts) // 2,
                bytes_accessed=n_p * c_p * elem + n_p * n_p * 4),
        )(jnp.asarray(oi), jnp.asarray(oj), h)
    else:
        # Fallback for very large h: full 2-D output grid with streamed row/col tiles.
        out_p = pl.pallas_call(
            functools.partial(_adj_full_kernel, approx=approx),
            out_shape=jax.ShapeDtypeStruct((n_p, n_p), jnp.float32),
            grid=(n_p // ts, n_p // ts),
            in_specs=[
                pl.BlockSpec((ts, c_p), lambda i, j: (i, 0)),
                pl.BlockSpec((ts, c_p), lambda i, j: (j, 0)),
            ],
            out_specs=pl.BlockSpec((ts, ts), lambda i, j: (i, j)),
            compiler_params=pltpu.CompilerParams(
                dimension_semantics=("parallel", "parallel"),
                vmem_limit_bytes=_VMEM_LIMIT),
            cost_estimate=pl.CostEstimate(
                flops=2 * n_p * n_p * c_p, transcendentals=n_p * n_p,
                bytes_accessed=2 * n_p * c_p * elem + n_p * n_p * 4),
        )(h, h)

    # Skip the un-pad slice (an extra N^2 HBM copy) when no padding was added.
    return out_p if n == n_p else out_p[:n, :n]


def reference(z, edge_index, weight, bias):
    a_hat, dinv = adjacency_and_dinv(edge_index, z.shape[0])
    a_norm = dinv[:, None] * a_hat * dinv[None, :]
    h = jnp.maximum(a_norm @ (z @ weight) + bias[None, :], 0.0)
    return jax.nn.sigmoid(h @ h.T)


if __name__ == "__main__":
    num_nodes = 200        # pads to 256 -> 2x2 stage-2 tile grid (exercises mirrored writes + slice)
    in_channels = 32
    num_edges = 600

    key = jax.random.PRNGKey(0)
    kz, ke1, ke2, kw = jax.random.split(key, 4)

    z = jax.random.normal(kz, (num_nodes, in_channels), dtype=jnp.float32)
    src = jax.random.randint(ke1, (num_edges,), 0, num_nodes, dtype=jnp.int32)
    dst = jax.random.randint(ke2, (num_edges,), 0, num_nodes, dtype=jnp.int32)
    edge_index = jnp.stack([src, dst], axis=0)  # [2, E]

    # GCNConv params: glorot-style weight [in, out], zero bias [out].
    limit = jnp.sqrt(6.0 / (in_channels + in_channels))
    weight = jax.random.uniform(
        kw, (in_channels, in_channels), minval=-limit, maxval=limit, dtype=jnp.float32)
    bias = jnp.zeros((in_channels,), jnp.float32)

    ref = reference(z, edge_index, weight, bias)

    # Exact-semantics check: f32 operands end-to-end, exact (non-approx) sigmoid.
    adj_f32 = jax.block_until_ready(
        adjacency_decoder(z, edge_index, weight, bias, compute_dtype=jnp.float32))
    assert adj_f32.shape == (num_nodes, num_nodes)
    assert jnp.allclose(adj_f32, ref, atol=1e-4, rtol=1e-4)

    # Performance config (default): bf16 MXU operands (exact 0/1 A_hat), f32 accumulation.
    adj_bf16 = jax.block_until_ready(adjacency_decoder(z, edge_index, weight, bias))
    assert adj_bf16.shape == (num_nodes, num_nodes)
    assert jnp.allclose(adj_bf16, ref, atol=3e-2, rtol=0)

    print("KERNEL_OK")
</pallas_src>

<mosaic_0001>
module attributes {stable_mosaic.version = 11 : i64} {
  func.func @_xw_kernel(%arg0: i32, %arg1: i32, %arg2: memref<128x128xf32, #tpu.memory_space<vmem>>, %arg3: memref<128x128xf32, #tpu.memory_space<vmem>>, %arg4: memref<128x1xf32, #tpu.memory_space<vmem>>, %arg5: memref<128x128xf32, #tpu.memory_space<vmem>>) attributes {dimension_semantics = [#tpu.dimension_semantics<parallel>, #tpu.dimension_semantics<parallel>], iteration_bounds = array<i64: 2, 1>, scalar_prefetch = 0 : i64, scratch_operands = 0 : i64, tpu.core_type = #tpu.core_type<tc>, window_params = [{transform_indices = @transform_0, window_bounds = array<i64: 128, 128>}, {transform_indices = @transform_1, window_bounds = array<i64: 128, 128>}, {transform_indices = @transform_2, window_bounds = array<i64: 128, 1>}, {transform_indices = @transform_3, window_bounds = array<i64: 128, 128>}]} {
    %c0 = arith.constant 0 : index
    %c0_0 = arith.constant 0 : index
    %0 = vector.load %arg2[%c0, %c0_0] : memref<128x128xf32, #tpu.memory_space<vmem>>, vector<128x128xf32>
    %c0_1 = arith.constant 0 : index
    %c0_2 = arith.constant 0 : index
    %1 = vector.load %arg3[%c0_1, %c0_2] : memref<128x128xf32, #tpu.memory_space<vmem>>, vector<128x128xf32>
    %cst = arith.constant dense<0.000000e+00> : vector<128x128xf32>
    %2 = tpu.matmul %0, %1, %cst {dimension_numbers = #tpu.dot_dimension_numbers<[1], [0], [0], [1], [0, 0, 1, 1], [], []>} : vector<128x128xf32>, vector<128x128xf32>, vector<128x128xf32> -> vector<128x128xf32>
    %c0_3 = arith.constant 0 : index
    %c0_4 = arith.constant 0 : index
    %3 = vector.load %arg4[%c0_3, %c0_4] : memref<128x1xf32, #tpu.memory_space<vmem>>, vector<128x1xf32>
    %4 = vector.broadcast %3 : vector<128x1xf32> to vector<128x128xf32>
    %5 = arith.mulf %4, %2 : vector<128x128xf32>
    %c0_5 = arith.constant 0 : index
    %c0_6 = arith.constant 0 : index
    %6 = vector.load %arg5[%c0_5, %c0_6] : memref<128x128xf32, #tpu.memory_space<vmem>>, vector<128x128xf32>
    tpu.vector_store %arg5[%c0_5, %c0_6], %5 {strides = array<i32>} : memref<128x128xf32, #tpu.memory_space<vmem>>, vector<128x128xf32>,
    return
  }
  func.func @transform_0(%arg0: i32, %arg1: i32) -> (i32, i32) {
    %c0_i32 = arith.constant 0 : i32
    %c0_i32_0 = arith.constant 0 : i32
    return %arg0, %c0_i32 : i32, i32
  }
  func.func @transform_1(%arg0: i32, %arg1: i32) -> (i32, i32) {
    %c0_i32 = arith.constant 0 : i32
    %c0_i32_0 = arith.constant 0 : i32
    return %c0_i32, %arg1 : i32, i32
  }
  func.func @transform_2(%arg0: i32, %arg1: i32) -> (i32, i32) {
    %c0_i32 = arith.constant 0 : i32
    %c0_i32_0 = arith.constant 0 : i32
    return %arg0, %c0_i32 : i32, i32
  }
  func.func @transform_3(%arg0: i32, %arg1: i32) -> (i32, i32) {
    %c0_i32 = arith.constant 0 : i32
    return %arg0, %arg1 : i32, i32
  }
}

module attributes {stable_mosaic.version = 11 : i64} {
  func.func @_h_kernel(%arg0: i32, %arg1: i32, %arg2: memref<128x256xf32, #tpu.memory_space<vmem>>, %arg3: memref<256x128xf32, #tpu.memory_space<vmem>>, %arg4: memref<1x128xf32, #tpu.memory_space<vmem>>, %arg5: memref<128x1xf32, #tpu.memory_space<vmem>>, %arg6: memref<128x128xf32, #tpu.memory_space<vmem>>, %arg7: memref<128x128xf32, #tpu.memory_space<vmem>>) attributes {dimension_semantics = [#tpu.dimension_semantics<parallel>, #tpu.dimension_semantics<arbitrary>], iteration_bounds = array<i64: 2, 1>, scalar_prefetch = 0 : i64, scratch_operands = 1 : i64, tpu.core_type = #tpu.core_type<tc>, window_params = [{transform_indices = @transform_0, window_bounds = array<i64: 128, 256>}, {pipeline_mode = #tpu.pipeline_mode<synchronous>, transform_indices = @transform_1, window_bounds = array<i64: 256, 128>}, {pipeline_mode = #tpu.pipeline_mode<synchronous>, transform_indices = @transform_2, window_bounds = array<i64: 1, 128>}, {transform_indices = @transform_3, window_bounds = array<i64: 128, 1>}, {transform_indices = @transform_4, window_bounds = array<i64: 128, 128>}]} {
    %c0_i32 = arith.constant 0 : i32
    %0 = arith.cmpi eq, %arg1, %c0_i32 : i32
    %1 = arith.extui %0 : i1 to i32
    %c0_i32_0 = arith.constant 0 : i32
    %2 = arith.cmpi ne, %1, %c0_i32_0 : i32
    scf.if %2 {
      %cst_9 = arith.constant 0.000000e+00 : f32
      %15 = vector.broadcast %cst_9 : f32 to vector<128x128xf32>
      %c0_10 = arith.constant 0 : index
      %c0_11 = arith.constant 0 : index
      %16 = vector.load %arg7[%c0_10, %c0_11] : memref<128x128xf32, #tpu.memory_space<vmem>>, vector<128x128xf32>
      tpu.vector_store %arg7[%c0_10, %c0_11], %15 {strides = array<i32>} : memref<128x128xf32, #tpu.memory_space<vmem>>, vector<128x128xf32>,
    } else {
    }
    %c256_i32 = arith.constant 256 : i32
    %3 = arith.muli %arg1, %c256_i32 : i32
    %4 = tpu.assume_multiple %3, 256 : i32
    %5 = arith.index_cast %4 : i32 to index
    %c0 = arith.constant 0 : index
    %6 = vector.load %arg3[%5, %c0] : memref<256x128xf32, #tpu.memory_space<vmem>>, vector<256x128xf32>
    %c0_1 = arith.constant 0 : index
    %c0_2 = arith.constant 0 : index
    %7 = vector.load %arg7[%c0_1, %c0_2] : memref<128x128xf32, #tpu.memory_space<vmem>>, vector<128x128xf32>
    %c0_3 = arith.constant 0 : index
    %c0_4 = arith.constant 0 : index
    %8 = vector.load %arg2[%c0_3, %c0_4] : memref<128x256xf32, #tpu.memory_space<vmem>>, vector<128x256xf32>
    %cst = arith.constant dense<0.000000e+00> : vector<128x128xf32>
    %9 = tpu.matmul %8, %6, %cst {dimension_numbers = #tpu.dot_dimension_numbers<[1], [0], [0], [1], [0, 0, 1, 1], [], []>} : vector<128x256xf32>, vector<256x128xf32>, vector<128x128xf32> -> vector<128x128xf32>
    %10 = arith.addf %7, %9 : vector<128x128xf32>
    %c0_5 = arith.constant 0 : index
    %c0_6 = arith.constant 0 : index
    %11 = vector.load %arg7[%c0_5, %c0_6] : memref<128x128xf32, #tpu.memory_space<vmem>>, vector<128x128xf32>
    tpu.vector_store %arg7[%c0_5, %c0_6], %10 {strides = array<i32>} : memref<128x128xf32, #tpu.memory_space<vmem>>, vector<128x128xf32>,
    %c0_i32_7 = arith.constant 0 : i32
    %12 = arith.cmpi eq, %arg1, %c0_i32_7 : i32
    %13 = arith.extui %12 : i1 to i32
    %c0_i32_8 = arith.constant 0 : i32
    %14 = arith.cmpi ne, %13, %c0_i32_8 : i32
    scf.if %14 {
      %c0_9 = arith.constant 0 : index
      %c0_10 = arith.constant 0 : index
      %15 = vector.load %arg5[%c0_9, %c0_10] : memref<128x1xf32, #tpu.memory_space<vmem>>, vector<128x1xf32>
      %c0_11 = arith.constant 0 : index
      %c0_12 = arith.constant 0 : index
      %16 = vector.load %arg7[%c0_11, %c0_12] : memref<128x128xf32, #tpu.memory_space<vmem>>, vector<128x128xf32>
      %17 = vector.broadcast %15 : vector<128x1xf32> to vector<128x128xf32>
      %18 = arith.mulf %17, %16 : vector<128x128xf32>
      %c0_13 = arith.constant 0 : index
      %c0_14 = arith.constant 0 : index
      %19 = vector.load %arg4[%c0_13, %c0_14] : memref<1x128xf32, #tpu.memory_space<vmem>>, vector<1x128xf32>
      %20 = vector.broadcast %19 : vector<1x128xf32> to vector<128x128xf32>
      %21 = arith.addf %18, %20 : vector<128x128xf32>
      %cst_15 = arith.constant 0.000000e+00 : f32
      %22 = vector.broadcast %cst_15 : f32 to vector<128x128xf32>
      %23 = arith.maximumf %21, %22 : vector<128x128xf32>
      %c0_16 = arith.constant 0 : index
      %c0_17 = arith.constant 0 : index
      %24 = vector.load %arg5[%c0_16, %c0_17] : memref<128x1xf32, #tpu.memory_space<vmem>>, vector<128x1xf32>
      %cst_18 = arith.constant 0.000000e+00 : f32
      %25 = vector.broadcast %cst_18 : f32 to vector<128x1xf32>
      %26 = arith.cmpf ogt, %24, %25 : vector<128x1xf32>
      %cst_19 = arith.constant 0.000000e+00 : f32
      %27 = vector.shape_cast %26 : vector<128x1xi1> to vector<128x1xi1>
      %28 = vector.broadcast %27 : vector<128x1xi1> to vector<128x128xi1>
      %29 = vector.broadcast %cst_19 : f32 to vector<128x128xf32>
      %30 = arith.select %28, %23, %29 : vector<128x128xi1>, vector<128x128xf32>
      %c0_20 = arith.constant 0 : index
      %c0_21 = arith.constant 0 : index
      %31 = vector.load %arg6[%c0_20, %c0_21] : memref<128x128xf32, #tpu.memory_space<vmem>>, vector<128x128xf32>
      tpu.vector_store %arg6[%c0_20, %c0_21], %30 {strides = array<i32>} : memref<128x128xf32, #tpu.memory_space<vmem>>, vector<128x128xf32>,
    } else {
    }
    return
  }
  func.func @transform_0(%arg0: i32, %arg1: i32) -> (i32, i32) {
    %c0_i32 = arith.constant 0 : i32
    return %arg0, %arg1 : i32, i32
  }
  func.func @transform_1(%arg0: i32, %arg1: i32) -> (i32, i32) {
    %c0_i32 = arith.constant 0 : i32
    %c0_i32_0 = arith.constant 0 : i32
    %c0_i32_1 = arith.constant 0 : i32
    return %c0_i32, %c0_i32_0 : i32, i32
  }
  func.func @transform_2(%arg0: i32, %arg1: i32) -> (i32, i32) {
    %c0_i32 = arith.constant 0 : i32
    %c0_i32_0 = arith.constant 0 : i32
    %c0_i32_1 = arith.constant 0 : i32
    return %c0_i32, %c0_i32_0 : i32, i32
  }
  func.func @transform_3(%arg0: i32, %arg1: i32) -> (i32, i32) {
    %c0_i32 = arith.constant 0 : i32
    %c0_i32_0 = arith.constant 0 : i32
    return %arg0, %c0_i32 : i32, i32
  }
  func.func @transform_4(%arg0: i32, %arg1: i32) -> (i32, i32) {
    %c0_i32 = arith.constant 0 : i32
    %c0_i32_0 = arith.constant 0 : i32
    return %arg0, %c0_i32 : i32, i32
  }
}

module attributes {stable_mosaic.version = 11 : i64} {
  func.func @_adj_sym_kernel(%arg0: i32, %arg1: i32, %arg2: memref<6xi32, #tpu.memory_space<smem>>, %arg3: memref<6xi32, #tpu.memory_space<smem>>, %arg4: memref<256x128xf32, #tpu.memory_space<vmem>>, %arg5: memref<128x128xf32, #tpu.memory_space<vmem>>, %arg6: memref<128x128xf32, #tpu.memory_space<vmem>>) attributes {dimension_semantics = [#tpu.dimension_semantics<parallel>, #tpu.dimension_semantics<arbitrary>], iteration_bounds = array<i64: 3, 2>, scalar_prefetch = 2 : i64, scratch_operands = 1 : i64, tpu.core_type = #tpu.core_type<tc>, window_params = [{pipeline_mode = #tpu.pipeline_mode<synchronous>, transform_indices = @transform_0, window_bounds = array<i64: 256, 128>}, {transform_indices = @transform_1, window_bounds = array<i64: 128, 128>}]} {
    %c0_i32 = arith.constant 0 : i32
    %0 = arith.cmpi eq, %arg1, %c0_i32 : i32
    %1 = arith.extui %0 : i1 to i32
    %c0_i32_0 = arith.constant 0 : i32
    %2 = arith.cmpi ne, %1, %c0_i32_0 : i32
    scf.if %2 {
      %c2_i32 = arith.constant 2 : i32
      %6 = arith.muli %c2_i32, %arg0 : i32
      %7 = arith.index_cast %6 : i32 to index
      %8 = memref.load %arg2[%7] : memref<6xi32, #tpu.memory_space<smem>>
      %c128_i32 = arith.constant 128 : i32
      %9 = arith.muli %8, %c128_i32 : i32
      %10 = tpu.assume_multiple %9, 128 : i32
      %c2_i32_2 = arith.constant 2 : i32
      %11 = arith.muli %c2_i32_2, %arg0 : i32
      %12 = arith.index_cast %11 : i32 to index
      %13 = memref.load %arg3[%12] : memref<6xi32, #tpu.memory_space<smem>>
      %c128_i32_3 = arith.constant 128 : i32
      %14 = arith.muli %13, %c128_i32_3 : i32
      %15 = tpu.assume_multiple %14, 128 : i32
      %16 = arith.index_cast %10 : i32 to index
      %c0 = arith.constant 0 : index
      %17 = vector.load %arg4[%16, %c0] : memref<256x128xf32, #tpu.memory_space<vmem>>, vector<128x128xf32>
      %18 = arith.index_cast %15 : i32 to index
      %c0_4 = arith.constant 0 : index
      %19 = vector.load %arg4[%18, %c0_4] : memref<256x128xf32, #tpu.memory_space<vmem>>, vector<128x128xf32>
      %cst = arith.constant dense<0.000000e+00> : vector<128x128xf32>
      %20 = tpu.matmul %17, %19, %cst {dimension_numbers = #tpu.dot_dimension_numbers<[1], [1], [0], [0], [0, 0, 1, 0], [], []>} : vector<128x128xf32>, vector<128x128xf32>, vector<128x128xf32> -> vector<128x128xf32>
      %21 = arith.negf %20 : vector<128x128xf32>
      %22 = math.exp %21 : vector<128x128xf32>
      %cst_5 = arith.constant 1.000000e+00 : f32
      %23 = vector.broadcast %cst_5 : f32 to vector<128x128xf32>
      %24 = arith.addf %23, %22 : vector<128x128xf32>
      %25 = arith.divf %23, %24 : vector<128x128xf32>
      %c0_6 = arith.constant 0 : index
      %c0_7 = arith.constant 0 : index
      %26 = vector.load %arg6[%c0_6, %c0_7] : memref<128x128xf32, #tpu.memory_space<vmem>>, vector<128x128xf32>
      tpu.vector_store %arg6[%c0_6, %c0_7], %25 {strides = array<i32>} : memref<128x128xf32, #tpu.memory_space<vmem>>, vector<128x128xf32>,
      %c0_8 = arith.constant 0 : index
      %c0_9 = arith.constant 0 : index
      %27 = vector.load %arg6[%c0_8, %c0_9] : memref<128x128xf32, #tpu.memory_space<vmem>>, vector<128x128xf32>
      %c0_10 = arith.constant 0 : index
      %c0_11 = arith.constant 0 : index
      %28 = vector.load %arg5[%c0_10, %c0_11] : memref<128x128xf32, #tpu.memory_space<vmem>>, vector<128x128xf32>
      tpu.vector_store %arg5[%c0_10, %c0_11], %27 {strides = array<i32>} : memref<128x128xf32, #tpu.memory_space<vmem>>, vector<128x128xf32>,
    } else {
    }
    %c1_i32 = arith.constant 1 : i32
    %3 = arith.cmpi eq, %arg1, %c1_i32 : i32
    %4 = arith.extui %3 : i1 to i32
    %c0_i32_1 = arith.constant 0 : i32
    %5 = arith.cmpi ne, %4, %c0_i32_1 : i32
    scf.if %5 {
      %c0 = arith.constant 0 : index
      %c0_2 = arith.constant 0 : index
      %6 = vector.load %arg6[%c0, %c0_2] : memref<128x128xf32, #tpu.memory_space<vmem>>, vector<128x128xf32>
      %7 = tpu.transpose %6, [1, 0] : vector<128x128xf32> -> vector<128x128xf32>
      %c0_3 = arith.constant 0 : index
      %c0_4 = arith.constant 0 : index
      %8 = vector.load %arg5[%c0_3, %c0_4] : memref<128x128xf32, #tpu.memory_space<vmem>>, vector<128x128xf32>
      tpu.vector_store %arg5[%c0_3, %c0_4], %7 {strides = array<i32>} : memref<128x128xf32, #tpu.memory_space<vmem>>, vector<128x128xf32>,
    } else {
    }
    return
  }
  func.func @transform_0(%arg0: i32, %arg1: i32, %arg2: memref<6xi32, #tpu.memory_space<smem>>, %arg3: memref<6xi32, #tpu.memory_space<smem>>) -> (i32, i32) {
    %c0_i32 = arith.constant 0 : i32
    %c0_i32_0 = arith.constant 0 : i32
    %c0_i32_1 = arith.constant 0 : i32
    return %c0_i32, %c0_i32_0 : i32, i32
  }
  func.func @transform_1(%arg0: i32, %arg1: i32, %arg2: memref<6xi32, #tpu.memory_space<smem>>, %arg3: memref<6xi32, #tpu.memory_space<smem>>) -> (i32, i32) {
    %c2_i32 = arith.constant 2 : i32
    %0 = arith.muli %c2_i32, %arg0 : i32
    %1 = arith.addi %0, %arg1 : i32
    %2 = arith.index_cast %1 : i32 to index
    %3 = memref.load %arg2[%2] : memref<6xi32, #tpu.memory_space<smem>>
    %c2_i32_0 = arith.constant 2 : i32
    %4 = arith.muli %c2_i32_0, %arg0 : i32
    %5 = arith.addi %4, %arg1 : i32
    %6 = arith.index_cast %5 : i32 to index
    %7 = memref.load %arg3[%6] : memref<6xi32, #tpu.memory_space<smem>>
    %c0_i32 = arith.constant 0 : i32
    return %3, %7 : i32, i32
  }
}

</mosaic_0001>

<bundles_post_ra>
// kernel: adjacency_decoder.3
= control target key start
LH: loop header
LB: loop body
LE: loop exit
PB: predicated region body
PF: predicated region fallthrough
CT: control target
= control target key end

     0   :  { %s695_s12 = smov 0   ;;  %s697_s13 = smov 0   ;;  %s841_s0 = inlined_call_operand.vmem [shape: f32[256,128], index: 0, kind: input, shape index: {}]   ;;  %s842_s1 = inlined_call_operand.vmem [shape: f32[128,128], index: 1, kind: input, shape index: {}]   ;;  %s843_s2 = inlined_call_operand.vmem [shape: f32[256,1], index: 2, kind: input, shape index: {}]   ;;  %s844_s3 = inlined_call_operand.vmem [shape: f32[256,128], index: 3, kind: output, shape index: {}]  }
   0x1   :  { %s699_s14 = smov 0  }
   0x2 LB: > { %s25_s15 = sadd.s32 1, %s668_s13  ;;  %p565_p0 = scmp.ge.s32.totalorder %s672_s14, 1  ;;  %s672_s14 = sphi %s699_s14, %s13_s14   ;;  %s668_s13 = sphi %s697_s13, %s846_s13   ;;  %s664_s12 = sphi %s695_s12, %s845_s12  }
   0x3   : > { %p27_p1 = scmp.ge.s32.totalorder %s25_s15, 2  ;;  %p172_p2 = scmp.lt.s32.totalorder %s672_s14, 3 }
   0x5   : > { %s848_s15 = smov (%p27_p1, %s25_s15), 0  ;;  %p173_p3 = pnand %p565_p0, %p172_p2 }
   0x6   : > { %s566_s20 = sshll.u32 (!%p173_p3), %s664_s12, 4 }
   0x7   : > { %176 = sbr.rel (%p173_p3) target bundleno = 211 (0xd3), region = 32  ;;  %p209_p4 = scmp.lt.s32.totalorder (!%p173_p3), %s566_s20, 31 }
   0xc   : > { %v264_v0 = vld [vmem:[%s842_s1 + $0x78] sm:$0xff]  ;;  %v263_v1 = vld [vmem:[%s842_s1 + $0x70] sm:$0xff]  ;;  %v262_v2 = vld [vmem:[%s842_s1 + $0x68] sm:$0xff]  ;;  %s850_s20 = smov (!%p209_p4, %s566_s20), 31  ;;  %v674_v4 = vmov 0  }
   0xd   : > { %265 = vmatpush.msra.mxu0 %v264_v0  ;;  %574 = vmatpush.msra.mxu1 %v264_v0  ;;  %v261_v3 = vld [vmem:[%s842_s1 + $0x60] sm:$0xff]  ;;  %s725_s25 = sshll.u32 %s850_s20, 3  ;;  %v260_v6 = vld [vmem:[%s842_s1 + $0x58] sm:$0xff]  ;;  %v259_v8 = vld [vmem:[%s842_s1 + $0x50] sm:$0xff] }
   0xe   : > { %575 = vmatpush.msra.mxu2 %v264_v0  ;;  %576 = vmatpush.msra.mxu3 %v264_v0  ;;  %s731_s28 = scalar_lea.vmem %s843_s2, %s725_s25  ;;  %v258_v9 = vld [vmem:[%s842_s1 + $0x48] sm:$0xff]  ;;  %v257_v10 = vld [vmem:[%s842_s1 + $0x40] sm:$0xff]  ;;  %v256_v12 = vld [vmem:[%s842_s1 + $0x38] sm:$0xff]  ;;  %s781_s6 = scalar_lea.vmem %s841_s0, %s725_s25 }
   0xf   : > { %266 = vmatpush.msra.mxu0 %v263_v1  ;;  %577 = vmatpush.msra.mxu1 %v263_v1  ;;  %v330_v5 = vld [vmem:[%s731_s28] sm:$0xff]  ;;  %v332_v7 = vld [vmem:[%s731_s28 + $0x10] sm:$0xff]  ;;  %v331_v11 = vld [vmem:[%s731_s28 + $0x8] sm:$0xff]  ;;  %s814_s9 = scalar_lea.vmem %s844_s3, %s725_s25 }
  0x10   : > { %578 = vmatpush.msra.mxu2 %v263_v1  ;;  %579 = vmatpush.msra.mxu3 %v263_v1  ;;  %v333_v13 = vld [vmem:[%s731_s28 + $0x18] sm:$0xff]  ;;  %v255_v14 = vld [vmem:[%s842_s1 + $0x30] sm:$0xff]  ;;  %v254_v15 = vld [vmem:[%s842_s1 + $0x28] sm:$0xff] }
  0x11   : > { %267 = vmatpush.msra.mxu0 %v262_v2  ;;  %580 = vmatpush.msra.mxu1 %v262_v2  ;;  %v253_v16 = vld [vmem:[%s842_s1 + $0x20] sm:$0xff]  ;;  %v336_v17 = vld [vmem:[%s731_s28 + $0x30] sm:$0xff]  ;;  %v252_v18 = vld [vmem:[%s842_s1 + $0x18] sm:$0xff] }
  0x12   : > { %581 = vmatpush.msra.mxu2 %v262_v2  ;;  %582 = vmatpush.msra.mxu3 %v262_v2  ;;  %v337_v19 = vld [vmem:[%s731_s28 + $0x38] sm:$0xff]  ;;  %v251_v20 = vld [vmem:[%s842_s1 + $0x10] sm:$0xff]  ;;  %v250_v21 = vld [vmem:[%s842_s1 + $0x8] sm:$0xff] }
  0x13   : > { %647 = vset.pattern.permute.xlu0 %v674_v4  ;;  %268 = vmatpush.msra.mxu0 %v261_v3  ;;  %v249_v22 = vld [vmem:[%s842_s1] sm:$0xff]  ;;  %v339_v23 = vld [vmem:[%s731_s28 + $0x48] sm:$0xff]  ;;  %v340_v29 = vld [vmem:[%s731_s28 + $0x50] sm:$0xff] }
  0x14   : > { %583 = vmatpush.msra.mxu1 %v261_v3  ;;  %584 = vmatpush.msra.mxu2 %v261_v3  ;;  %v233_v24 = vld [vmem:[%s781_s6] sm:$0xff]  ;;  %v234_v31 = vld [vmem:[%s781_s6 + $0x8] sm:$0xff]  ;;  %v345_v37 = vld [vmem:[%s731_s28 + $0x78] sm:$0xff] }
  0x15   : > { %585 = vmatpush.msra.mxu3 %v261_v3  ;;  %648 = vset.pattern.permute.xlu1 %v674_v4  ;;  %v237_v25 = vld [vmem:[%s781_s6 + $0x20] sm:$0xff]  ;;  %v238_v32 = vld [vmem:[%s781_s6 + $0x28] sm:$0xff]  ;;  %v235_v38 = vld [vmem:[%s781_s6 + $0x10] sm:$0xff] }
  0x16   : > { %348 = vperm.xlu0 %647, %v330_v5   ;;  %269 = vmatpush.msra.mxu0 %v260_v6  ;;  %v241_v26 = vld [vmem:[%s781_s6 + $0x40] sm:$0xff]  ;;  %v242_v33 = vld [vmem:[%s781_s6 + $0x48] sm:$0xff]  ;;  %v239_v39 = vld [vmem:[%s781_s6 + $0x30] sm:$0xff] }
  0x17   : > { %586 = vmatpush.msra.mxu1 %v260_v6  ;;  %587 = vmatpush.msra.mxu2 %v260_v6  ;;  %v245_v27 = vld [vmem:[%s781_s6 + $0x60] sm:$0xff]  ;;  %v246_v34 = vld [vmem:[%s781_s6 + $0x68] sm:$0xff]  ;;  %v243_v40 = vld [vmem:[%s781_s6 + $0x50] sm:$0xff] }
  0x18   : > { %588 = vmatpush.msra.mxu3 %v260_v6  ;;  %358 = vperm.xlu1 %648, %v332_v7   ;;  %v334_v28 = vld [vmem:[%s731_s28 + $0x20] sm:$0xff]  ;;  %v335_v35 = vld [vmem:[%s731_s28 + $0x28] sm:$0xff]  ;;  %v247_v41 = vld [vmem:[%s781_s6 + $0x70] sm:$0xff] }
  0x19   : > { %270 = vmatpush.msra.mxu0 %v259_v8  ;;  %589 = vmatpush.msra.mxu1 %v259_v8  ;;  %v342_v30 = vld [vmem:[%s731_s28 + $0x60] sm:$0xff]  ;;  %v343_v36 = vld [vmem:[%s731_s28 + $0x68] sm:$0xff]  ;;  %v236_v43 = vld [vmem:[%s781_s6 + $0x18] sm:$0xff] }
  0x1a   : > { %590 = vmatpush.msra.mxu2 %v259_v8  ;;  %591 = vmatpush.msra.mxu3 %v259_v8  ;;  %v338_v42 = vld [vmem:[%s731_s28 + $0x40] sm:$0xff]  ;;  %v240_v44 = vld [vmem:[%s781_s6 + $0x38] sm:$0xff]  ;;  %v344_v48 = vld [vmem:[%s731_s28 + $0x70] sm:$0xff] }
  0x1b   : > { %271 = vmatpush.msra.mxu0 %v258_v9  ;;  %592 = vmatpush.msra.mxu1 %v258_v9  ;;  %v244_v45 = vld [vmem:[%s781_s6 + $0x58] sm:$0xff] }
  0x1c   : > { %593 = vmatpush.msra.mxu2 %v258_v9  ;;  %594 = vmatpush.msra.mxu3 %v258_v9  ;;  %v248_v46 = vld [vmem:[%s781_s6 + $0x78] sm:$0xff] }
  0x1d   : > { %272 = vmatpush.msra.mxu0 %v257_v10  ;;  %595 = vmatpush.msra.mxu1 %v257_v10  ;;  %v341_v47 = vld [vmem:[%s731_s28 + $0x58] sm:$0xff] }
  0x1e   : > { %596 = vmatpush.msra.mxu2 %v257_v10  ;;  %597 = vmatpush.msra.mxu3 %v257_v10 }
  0x1f   : > { %353 = vperm.xlu0 %647, %v331_v11   ;;  %273 = vmatpush.msra.mxu0 %v256_v12 }
  0x20   : > { %598 = vmatpush.msra.mxu1 %v256_v12  ;;  %599 = vmatpush.msra.mxu2 %v256_v12 }
  0x21   : > { %600 = vmatpush.msra.mxu3 %v256_v12  ;;  %363 = vperm.xlu1 %648, %v333_v13  }
  0x22   : > { %274 = vmatpush.msra.mxu0 %v255_v14  ;;  %601 = vmatpush.msra.mxu1 %v255_v14 }
  0x23   : > { %602 = vmatpush.msra.mxu2 %v255_v14  ;;  %603 = vmatpush.msra.mxu3 %v255_v14 }
  0x24   : > { %275 = vmatpush.msra.mxu0 %v254_v15  ;;  %604 = vmatpush.msra.mxu1 %v254_v15 }
  0x25   : > { %605 = vmatpush.msra.mxu2 %v254_v15  ;;  %606 = vmatpush.msra.mxu3 %v254_v15 }
  0x26   : > { %276 = vmatpush.msra.mxu0 %v253_v16  ;;  %607 = vmatpush.msra.mxu1 %v253_v16 }
  0x27   : > { %608 = vmatpush.msra.mxu2 %v253_v16  ;;  %609 = vmatpush.msra.mxu3 %v253_v16 }
  0x28   : > { %378 = vperm.xlu0 %647, %v336_v17   ;;  %277 = vmatpush.msra.mxu0 %v252_v18 }
  0x29   : > { %610 = vmatpush.msra.mxu1 %v252_v18  ;;  %611 = vmatpush.msra.mxu2 %v252_v18 }
  0x2a   : > { %612 = vmatpush.msra.mxu3 %v252_v18  ;;  %383 = vperm.xlu1 %648, %v337_v19  }
  0x2b   : > { %278 = vmatpush.msra.mxu0 %v251_v20  ;;  %613 = vmatpush.msra.mxu1 %v251_v20 }
  0x2c   : > { %614 = vmatpush.msra.mxu2 %v251_v20  ;;  %615 = vmatpush.msra.mxu3 %v251_v20 }
  0x2d   : > { %279 = vmatpush.msra.mxu0 %v250_v21  ;;  %616 = vmatpush.msra.mxu1 %v250_v21 }
  0x2e   : > { %617 = vmatpush.msra.mxu2 %v250_v21  ;;  %618 = vmatpush.msra.mxu3 %v250_v21 }
  0x2f   : > { %280 = vmatpush.msra.mxu0 %v249_v22  ;;  %619 = vmatpush.msra.mxu1 %v249_v22 }
  0x30   : > { %620 = vmatpush.msra.mxu2 %v249_v22  ;;  %621 = vmatpush.msra.mxu3 %v249_v22 }
  0x31   : > { %649 = vset.pattern.permute.xlu2 %v674_v4  ;;  %393 = vperm.xlu0 %647, %v339_v23  }
  0x32   : > { %281 = vmatmul.f32.vlgmr.msra.gmra.mxu0 %v233_v24  ;;  %293 = vmatmul.f32.vlgmr.msra.gmra.mxu1 %v237_v25 }
  0x33   : > { %305 = vmatmul.f32.vlgmr.msra.gmra.mxu2 %v241_v26  ;;  %317 = vmatmul.f32.vlgmr.msra.gmra.mxu3 %v245_v27 }
  0x34   : > { %368 = vperm.xlu2 %649, %v334_v28   ;;  %398 = vperm.xlu1 %648, %v340_v29  }
  0x39   : > { %408 = vperm.xlu0 %647, %v342_v30  }
  0x3a   : > { %284 = vmatmul.f32.gmra.mxu0 %v234_v31  ;;  %296 = vmatmul.f32.gmra.mxu1 %v238_v32 }
  0x3b   : > { %308 = vmatmul.f32.gmra.mxu2 %v242_v33  ;;  %320 = vmatmul.f32.gmra.mxu3 %v246_v34 }
  0x3c   : > { %373 = vperm.xlu2 %649, %v335_v35   ;;  %413 = vperm.xlu1 %648, %v343_v36  }
  0x41   : > { %423 = vperm.xlu0 %647, %v345_v37  }
  0x42   : > { %287 = vmatmul.f32.gmra.mxu0 %v235_v38  ;;  %299 = vmatmul.f32.gmra.mxu1 %v239_v39 }
  0x43   : > { %311 = vmatmul.f32.gmra.mxu2 %v243_v40  ;;  %323 = vmatmul.f32.gmra.mxu3 %v247_v41 }
  0x44   : > { %388 = vperm.xlu2 %649, %v338_v42  }
  0x4a   : > { %290 = vmatmul.f32.gmra.mxu0 %v236_v43  ;;  %302 = vmatmul.f32.gmra.mxu1 %v240_v44 }
  0x4b   : > { %314 = vmatmul.f32.gmra.mxu2 %v244_v45  ;;  %326 = vmatmul.f32.gmra.mxu3 %v248_v46 }
  0x4c   : > { %403 = vperm.xlu2 %649, %v341_v47  }
  0x54   : > { %418 = vperm.xlu2 %649, %v344_v48  }
  0x88   : > { %v349_v49 = vpop.permute.xlu0 %348 }
  0x8a   : > { %v359_v50 = vpop.permute.xlu1 %358 }
  0x8e   : > { %v369_v52 = vpop.permute.xlu2 %368 }
  0x91   : > { %v354_v51 = vpop.permute.xlu0 %353 }
  0x93   : > { %v364_v53 = vpop.permute.xlu1 %363 }
  0x96   : > { %v374_v55 = vpop.permute.xlu2 %373 }
  0x9a   : > { %v379_v54 = vpop.permute.xlu0 %378 }
  0x9c   : > { %v384_v56 = vpop.permute.xlu1 %383 }
  0x9e   : > { %v389_v62 = vpop.permute.xlu2 %388 }
  0xa3   : > { %v394_v57 = vpop.permute.xlu0 %393 }
  0xa6   : > { %v399_v63 = vpop.permute.xlu1 %398  ;;  %v404_v9 = vpop.permute.xlu2 %403 }
  0xab   : > { %v409_v0 = vpop.permute.xlu0 %408 }
  0xae   : > { %v414_v10 = vpop.permute.xlu1 %413  ;;  %v419_v19 = vpop.permute.xlu2 %418 }
  0xaf   : > { %v282_v58 = vpop.f32.mrf.mxu0  ;;  %v294_v59 = vpop.f32.mrf.mxu1 }
  0xb0   : > { %v426_v60 = vmul.f32 %v349_v49, %v282_v58  ;;  %v430_v61 = vmul.f32 %v369_v52, %v294_v59 }
  0xb2   : > { %442 = vst [vmem:[%s814_s9] sm:$0xff] %v426_v60 }
  0xb3   : > { %446 = vst [vmem:[%s814_s9 + $0x20] sm:$0xff] %v430_v61  ;;  %v424_v28 = vpop.permute.xlu0 %423 }
  0xb6   : > { %v306_v1 = vpop.f32.mrf.mxu2  ;;  %v318_v2 = vpop.f32.mrf.mxu3 }
  0xb7   : > { %v434_v3 = vmul.f32 %v389_v62, %v306_v1  ;;  %v438_v4 = vmul.f32 %v409_v0, %v318_v2  ;;  %v285_v5 = vpop.f32.mrf.mxu0  ;;  %v297_v6 = vpop.f32.mrf.mxu1 }
  0xb8   : > { %v427_v7 = vmul.f32 %v354_v51, %v285_v5  ;;  %v431_v8 = vmul.f32 %v374_v55, %v297_v6 }
  0xb9   : > { %450 = vst [vmem:[%s814_s9 + $0x40] sm:$0xff] %v434_v3 }
  0xba   : > { %454 = vst [vmem:[%s814_s9 + $0x60] sm:$0xff] %v438_v4 }
  0xbb   : > { %443 = vst [vmem:[%s814_s9 + $0x8] sm:$0xff] %v427_v7 }
  0xbc   : > { %447 = vst [vmem:[%s814_s9 + $0x28] sm:$0xff] %v431_v8 }
  0xbe   : > { %v309_v11 = vpop.f32.mrf.mxu2  ;;  %v321_v12 = vpop.f32.mrf.mxu3 }
  0xbf   : > { %v435_v13 = vmul.f32 %v394_v57, %v309_v11  ;;  %v439_v14 = vmul.f32 %v414_v10, %v321_v12  ;;  %v288_v15 = vpop.f32.mrf.mxu0  ;;  %v300_v16 = vpop.f32.mrf.mxu1 }
  0xc0   : > { %v428_v17 = vmul.f32 %v359_v50, %v288_v15  ;;  %v432_v18 = vmul.f32 %v379_v54, %v300_v16 }
  0xc1   : > { %451 = vst [vmem:[%s814_s9 + $0x48] sm:$0xff] %v435_v13 }
  0xc2   : > { %455 = vst [vmem:[%s814_s9 + $0x68] sm:$0xff] %v439_v14 }
  0xc3   : > { %444 = vst [vmem:[%s814_s9 + $0x10] sm:$0xff] %v428_v17 }
  0xc4   : > { %448 = vst [vmem:[%s814_s9 + $0x30] sm:$0xff] %v432_v18 }
  0xc6   : > { %v312_v20 = vpop.f32.mrf.mxu2  ;;  %v324_v21 = vpop.f32.mrf.mxu3 }
  0xc7   : > { %v436_v22 = vmul.f32 %v399_v63, %v312_v20  ;;  %v440_v23 = vmul.f32 %v419_v19, %v324_v21  ;;  %v291_v24 = vpop.f32.mrf.mxu0  ;;  %v303_v25 = vpop.f32.mrf.mxu1 }
  0xc8   : > { %v429_v26 = vmul.f32 %v364_v53, %v291_v24  ;;  %v433_v27 = vmul.f32 %v384_v56, %v303_v25 }
  0xc9   : > { %452 = vst [vmem:[%s814_s9 + $0x50] sm:$0xff] %v436_v22 }
  0xca   : > { %456 = vst [vmem:[%s814_s9 + $0x70] sm:$0xff] %v440_v23 }
  0xcb   : > { %445 = vst [vmem:[%s814_s9 + $0x18] sm:$0xff] %v429_v26 }
  0xcc   : > { %449 = vst [vmem:[%s814_s9 + $0x38] sm:$0xff] %v433_v27 }
  0xce   : > { %v315_v29 = vpop.f32.mrf.mxu2  ;;  %v327_v30 = vpop.f32.mrf.mxu3 }
  0xcf   : > { %v437_v31 = vmul.f32 %v404_v9, %v315_v29  ;;  %v441_v32 = vmul.f32 %v424_v28, %v327_v30 }
  0xd1   : > { %453 = vst [vmem:[%s814_s9 + $0x58] sm:$0xff] %v437_v31 }
  0xd2   : > { %457 = vst [vmem:[%s814_s9 + $0x78] sm:$0xff] %v441_v32 }
  0xd3 PF: > { %s13_s14 = sadd.s32 1, %s672_s14   ;;  %s845_s12 = smov %s668_s13 }
  0xd4   : > { %p10_p5 = scmp.ge.s32.totalorder %s13_s14, 4   ;;  %s846_s13 = smov %s848_s15 }
  0xd6   :  { %12 = sbr.rel (!%p10_p5) target bundleno = 2 (0x2), region = 68 }

// kernel: adjacency_decoder.5
= control target key start
LH: loop header
LB: loop body
LE: loop exit
PB: predicated region body
PF: predicated region fallthrough
CT: control target
= control target key end

     0   :  { %s1114_s18 = smov [#allocation4]   ;;  %s1115_s19 = smov [#allocation5]   ;;  %s1505_s0 = inlined_call_operand.vmem [shape: s32[6], index: 0, kind: input, shape index: {}]   ;;  %s1506_s2 = inlined_call_operand.vmem [shape: f32[256,128], index: 2, kind: input, shape index: {}]   ;;  %s1507_s3 = inlined_call_operand.vmem [shape: f32[256,256], index: 3, kind: output, shape index: {}]   ;;  %s1508_s1 = inlined_call_operand.vmem [shape: s32[6], index: 1, kind: input, shape index: {}]  }
   0x1   :  { %s9_s14 = sshll.u32 %s1505_s0, 4  ;;  %s14_s17 = sshll.u32 %s1508_s1, 4  ;;  %s10_s14 = int_to_ptr.vmem [resolvable:$true] %s9_s14  ;;  %s15_s17 = int_to_ptr.vmem [resolvable:$true] %s14_s17 }
   0x2   :  { %12 = dma.vmem_to_smem %s10_s14, 16, %s1114_s18, [#allocation3] }
   0x3   :  { %17 = dma.vmem_to_smem %s15_s17, 16, %s1115_s19, [#allocation3] }
   0x4   :  { %1084 = dma.done.wait [#allocation3], 32 }
   0x5   :  { %1085 = vsyncadd [#allocation3], 4294967264 }
   0x6   :  { %20 = sfence }
   0x7   :  { %s1142_s20 = smov 0   ;;  %s1144_s21 = smov 0  }
   0x8   :  { %s1146_s22 = smov 0   ;;  %s1148_s0 = smov 0  }
   0x9   :  { %s1150_s23 = smov 0   ;;  %s1152_s1 = smov 0  }
   0xa   :  { %s1154_s24 = smov 0  }
   0xb LB: > { %s35_s25 = sadd.s32 1, %s1104_s23  ;;  %s38_s26 = sadd.s32 1, %s1108_s1  ;;  %s1112_s24 = sphi %s1154_s24, %s26_s24   ;;  %s1108_s1 = sphi %s1152_s1, %s1533_s1   ;;  %s1104_s23 = sphi %s1150_s23, %s1532_s23   ;;  %s1100_s0 = sphi %s1148_s0, %s1531_s0   ;;  %s1096_s22 = sphi %s1146_s22, %s1530_s22   ;;  %s1092_s21 = sphi %s1144_s21, %s1529_s21   ;;  %s1088_s20 = sphi %s1142_s20, %s1528_s20  }
   0xc   : > { %p36_p0 = scmp.ge.s32.totalorder %s35_s25, 2  ;;  %s826_s27 = sadd.s32 4294967295, %s1112_s24  }
   0xd   : > { %s828_s28 = sshll.u32 %s1108_s1, 1  ;;  %p86_p1 = scmp.ne.s32.totalorder %s1092_s21, %s1088_s20 }
   0xe   : > { %s1535_s25 = smov (%p36_p0, %s35_s25), 0  ;;  %s1537_s26 = smov (!%p36_p0, %s38_s26), %s1108_s1 }
   0xf   : > { %s64_s29 = sadd.s32 %s1104_s23, %s828_s28  ;;  %p40_p2 = scmp.ge.s32.totalorder %s1537_s26, 3 }
  0x10   : > { %s65_s30 = sld [smem:[#allocation4 + %s64_s29]]  ;;  %p87_p3 = scmp.eq.s32.totalorder %s826_s27, 5 }
  0x11   : > { %s1539_s26 = smov (%p40_p2, %s1537_s26), 0  ;;  %p831_p5 = scmp.ge.s32.totalorder %s1112_s24, 1 }
  0x12   : > { %p1189_p4 = por %p87_p3, %p86_p1  ;;  %s829_s5 = sshll.u32 %s1539_s26, 1 }
  0x13   : > { %p114_p6 = scmp.lt.s32.totalorder %s1112_s24, 7  ;;  %s66_s6 = sld [smem:[#allocation5 + %s64_s29]] }
  0x14   : > { %s68_s7 = sadd.s32 %s829_s5, %s1535_s25  ;;  %s76_s13 = sadd.s32 1, %s1092_s21 }
  0x15   : > { %s69_s8 = sld [smem:[#allocation4 + %s68_s7]]  ;;  %p115_p7 = pnand %p831_p5, %p114_p6 }
  0x16   : > { %s70_s9 = sld [smem:[#allocation5 + %s68_s7]]  ;;  %s125_s15 = sand.u32 (!%p115_p7), 1, %s1088_s20  }
  0x17   : > { %s832_s16 = sshll.u32 (!%p115_p7), %s125_s15, 7  ;;  %p833_p9 = scmp.ne.s32.totalorder (!%p115_p7), %s1096_s22, 0 }
  0x18   : > { %s1202_s17 = scalar_lea.vmem (!%p115_p7), [#allocation6], %s832_s16 }
  0x1b   : > { %s71_s10 = ssub.s32 %s65_s30, %s69_s8 }
  0x1c   : > { %s72_s11 = ssub.s32 %s66_s6, %s70_s9  ;;  %118 = sbr.rel (%p115_p7) target bundleno = 638 (0x27e), region = 24 }
  0x1d   : > { %s73_s12 = sor.u32 %s72_s11, %s71_s10 }
  0x1e   : > { %p74_p8 = scmp.eq.s32.totalorder %s73_s12, 0 }
  0x20   : > { %s1199_s14 = scalar_select %p74_p8, %s1092_s21, %s76_s13  }
  0x21   : > { %136 = sbr.rel (%p833_p9) target bundleno = 316 (0x13c), region = 28  ;;  %s834_s18 = sshll.u32 (!%p833_p9), %s1100_s0, 1 }
  0x22   : > { %s140_s19 = sld [smem:[#allocation5 + %s834_s18]] (!%p833_p9) }
  0x23   : > { %s138_s20 = sld [smem:[#allocation4 + %s834_s18]] (!%p833_p9) }
  0x28   : > { %s836_s27 = sshll.u32 %s140_s19, 7 }
  0x29   : > { %s1211_s30 = scalar_lea.vmem %s1506_s2, %s836_s27  ;;  %s835_s5 = sshll.u32 %s138_s20, 7 }
  0x2a   : > { %v175_v0 = vld [vmem:[%s1211_s30 + $0x78] sm:$0xff]  ;;  %v174_v1 = vld [vmem:[%s1211_s30 + $0x70] sm:$0xff]  ;;  %v173_v2 = vld [vmem:[%s1211_s30 + $0x68] sm:$0xff]  ;;  %s1234_s8 = scalar_lea.vmem %s1506_s2, %s835_s5 }
  0x2b   : > { %176 = vmatpush.xpose.msra.mxu0 %v175_v0  ;;  %862 = vmatpush.xpose.msra.mxu1 %v175_v0  ;;  %v172_v3 = vld [vmem:[%s1211_s30 + $0x60] sm:$0xff]  ;;  %v171_v4 = vld [vmem:[%s1211_s30 + $0x58] sm:$0xff]  ;;  %v170_v5 = vld [vmem:[%s1211_s30 + $0x50] sm:$0xff] }
  0x2c   : > { %863 = vmatpush.xpose.msra.mxu2 %v175_v0  ;;  %864 = vmatpush.xpose.msra.mxu3 %v175_v0  ;;  %v169_v6 = vld [vmem:[%s1211_s30 + $0x48] sm:$0xff]  ;;  %v168_v7 = vld [vmem:[%s1211_s30 + $0x40] sm:$0xff]  ;;  %v167_v8 = vld [vmem:[%s1211_s30 + $0x38] sm:$0xff] }
  0x2d   : > { %v166_v9 = vld [vmem:[%s1211_s30 + $0x30] sm:$0xff]  ;;  %v165_v10 = vld [vmem:[%s1211_s30 + $0x28] sm:$0xff]  ;;  %v164_v11 = vld [vmem:[%s1211_s30 + $0x20] sm:$0xff] }
  0x2e   : > { %v163_v12 = vld [vmem:[%s1211_s30 + $0x18] sm:$0xff]  ;;  %v162_v13 = vld [vmem:[%s1211_s30 + $0x10] sm:$0xff]  ;;  %v161_v14 = vld [vmem:[%s1211_s30 + $0x8] sm:$0xff] }
  0x2f   : > { %177 = vmatpush.xpose.msra.mxu0 %v174_v1  ;;  %865 = vmatpush.xpose.msra.mxu1 %v174_v1  ;;  %v160_v15 = vld [vmem:[%s1211_s30] sm:$0xff]  ;;  %v144_v20 = vld [vmem:[%s1234_s8 + $0x8] sm:$0xff]  ;;  %v145_v24 = vld [vmem:[%s1234_s8 + $0x10] sm:$0xff] }
  0x30   : > { %866 = vmatpush.xpose.msra.mxu2 %v174_v1  ;;  %867 = vmatpush.xpose.msra.mxu3 %v174_v1  ;;  %v143_v16 = vld [vmem:[%s1234_s8] sm:$0xff]  ;;  %v148_v21 = vld [vmem:[%s1234_s8 + $0x28] sm:$0xff]  ;;  %v149_v25 = vld [vmem:[%s1234_s8 + $0x30] sm:$0xff] }
  0x31   : > { %v147_v17 = vld [vmem:[%s1234_s8 + $0x20] sm:$0xff]  ;;  %v152_v22 = vld [vmem:[%s1234_s8 + $0x48] sm:$0xff]  ;;  %v153_v26 = vld [vmem:[%s1234_s8 + $0x50] sm:$0xff] }
  0x32   : > { %v151_v18 = vld [vmem:[%s1234_s8 + $0x40] sm:$0xff]  ;;  %v156_v23 = vld [vmem:[%s1234_s8 + $0x68] sm:$0xff]  ;;  %v157_v27 = vld [vmem:[%s1234_s8 + $0x70] sm:$0xff] }
  0x33   : > { %178 = vmatpush.xpose.msra.mxu0 %v173_v2  ;;  %868 = vmatpush.xpose.msra.mxu1 %v173_v2  ;;  %v155_v19 = vld [vmem:[%s1234_s8 + $0x60] sm:$0xff]  ;;  %v146_v28 = vld [vmem:[%s1234_s8 + $0x18] sm:$0xff] }
  0x34   : > { %869 = vmatpush.xpose.msra.mxu2 %v173_v2  ;;  %870 = vmatpush.xpose.msra.mxu3 %v173_v2  ;;  %v150_v29 = vld [vmem:[%s1234_s8 + $0x38] sm:$0xff] }
  0x35   : > { %v154_v30 = vld [vmem:[%s1234_s8 + $0x58] sm:$0xff] }
  0x36   : > { %v158_v31 = vld [vmem:[%s1234_s8 + $0x78] sm:$0xff] }
  0x37   : > { %179 = vmatpush.xpose.msra.mxu0 %v172_v3  ;;  %871 = vmatpush.xpose.msra.mxu1 %v172_v3 }
  0x38   : > { %872 = vmatpush.xpose.msra.mxu2 %v172_v3  ;;  %873 = vmatpush.xpose.msra.mxu3 %v172_v3 }
  0x3b   : > { %180 = vmatpush.xpose.msra.mxu0 %v171_v4  ;;  %874 = vmatpush.xpose.msra.mxu1 %v171_v4 }
  0x3c   : > { %875 = vmatpush.xpose.msra.mxu2 %v171_v4  ;;  %876 = vmatpush.xpose.msra.mxu3 %v171_v4 }
  0x3f   : > { %181 = vmatpush.xpose.msra.mxu0 %v170_v5  ;;  %877 = vmatpush.xpose.msra.mxu1 %v170_v5 }
  0x40   : > { %878 = vmatpush.xpose.msra.mxu2 %v170_v5  ;;  %879 = vmatpush.xpose.msra.mxu3 %v170_v5 }
  0x43   : > { %182 = vmatpush.xpose.msra.mxu0 %v169_v6  ;;  %880 = vmatpush.xpose.msra.mxu1 %v169_v6 }
  0x44   : > { %881 = vmatpush.xpose.msra.mxu2 %v169_v6  ;;  %882 = vmatpush.xpose.msra.mxu3 %v169_v6 }
  0x47   : > { %183 = vmatpush.xpose.msra.mxu0 %v168_v7  ;;  %883 = vmatpush.xpose.msra.mxu1 %v168_v7 }
  0x48   : > { %884 = vmatpush.xpose.msra.mxu2 %v168_v7  ;;  %885 = vmatpush.xpose.msra.mxu3 %v168_v7 }
  0x4b   : > { %184 = vmatpush.xpose.msra.mxu0 %v167_v8  ;;  %886 = vmatpush.xpose.msra.mxu1 %v167_v8 }
  0x4c   : > { %887 = vmatpush.xpose.msra.mxu2 %v167_v8  ;;  %888 = vmatpush.xpose.msra.mxu3 %v167_v8 }
  0x4f   : > { %185 = vmatpush.xpose.msra.mxu0 %v166_v9  ;;  %889 = vmatpush.xpose.msra.mxu1 %v166_v9 }
  0x50   : > { %890 = vmatpush.xpose.msra.mxu2 %v166_v9  ;;  %891 = vmatpush.xpose.msra.mxu3 %v166_v9 }
  0x53   : > { %186 = vmatpush.xpose.msra.mxu0 %v165_v10  ;;  %892 = vmatpush.xpose.msra.mxu1 %v165_v10 }
  0x54   : > { %893 = vmatpush.xpose.msra.mxu2 %v165_v10  ;;  %894 = vmatpush.xpose.msra.mxu3 %v165_v10 }
  0x57   : > { %187 = vmatpush.xpose.msra.mxu0 %v164_v11  ;;  %895 = vmatpush.xpose.msra.mxu1 %v164_v11 }
  0x58   : > { %896 = vmatpush.xpose.msra.mxu2 %v164_v11  ;;  %897 = vmatpush.xpose.msra.mxu3 %v164_v11 }
  0x5b   : > { %188 = vmatpush.xpose.msra.mxu0 %v163_v12  ;;  %898 = vmatpush.xpose.msra.mxu1 %v163_v12 }
  0x5c   : > { %899 = vmatpush.xpose.msra.mxu2 %v163_v12  ;;  %900 = vmatpush.xpose.msra.mxu3 %v163_v12 }
  0x5f   : > { %189 = vmatpush.xpose.msra.mxu0 %v162_v13  ;;  %901 = vmatpush.xpose.msra.mxu1 %v162_v13 }
  0x60   : > { %902 = vmatpush.xpose.msra.mxu2 %v162_v13  ;;  %903 = vmatpush.xpose.msra.mxu3 %v162_v13 }
  0x63   : > { %190 = vmatpush.xpose.msra.mxu0 %v161_v14  ;;  %904 = vmatpush.xpose.msra.mxu1 %v161_v14 }
  0x64   : > { %905 = vmatpush.xpose.msra.mxu2 %v161_v14  ;;  %906 = vmatpush.xpose.msra.mxu3 %v161_v14 }
  0x67   : > { %191 = vmatpush.xpose.msra.mxu0 %v160_v15  ;;  %907 = vmatpush.xpose.msra.mxu1 %v160_v15 }
  0x68   : > { %908 = vmatpush.xpose.msra.mxu2 %v160_v15  ;;  %909 = vmatpush.xpose.msra.mxu3 %v160_v15 }
  0x6a   : > { %192 = vmatmul.f32.vlgmr.msra.gmra.mxu0 %v143_v16  ;;  %204 = vmatmul.f32.vlgmr.msra.gmra.mxu1 %v147_v17 }
  0x6b   : > { %216 = vmatmul.f32.vlgmr.msra.gmra.mxu2 %v151_v18  ;;  %228 = vmatmul.f32.vlgmr.msra.gmra.mxu3 %v155_v19 }
  0x72   : > { %195 = vmatmul.f32.gmra.mxu0 %v144_v20  ;;  %207 = vmatmul.f32.gmra.mxu1 %v148_v21 }
  0x73   : > { %219 = vmatmul.f32.gmra.mxu2 %v152_v22  ;;  %231 = vmatmul.f32.gmra.mxu3 %v156_v23 }
  0x7a   : > { %198 = vmatmul.f32.gmra.mxu0 %v145_v24  ;;  %210 = vmatmul.f32.gmra.mxu1 %v149_v25 }
  0x7b   : > { %222 = vmatmul.f32.gmra.mxu2 %v153_v26  ;;  %234 = vmatmul.f32.gmra.mxu3 %v157_v27 }
  0x82   : > { %201 = vmatmul.f32.gmra.mxu0 %v146_v28  ;;  %213 = vmatmul.f32.gmra.mxu1 %v150_v29 }
  0x83   : > { %225 = vmatmul.f32.gmra.mxu2 %v154_v30  ;;  %237 = vmatmul.f32.gmra.mxu3 %v158_v31 }
  0xe7   : > { %v193_v32 = vpop.f32.mrf.mxu0  ;;  %v205_v33 = vpop.f32.mrf.mxu1 }
  0xe8   : > { %v837_v34 = vmul.f32 -1.442695, %v193_v32  ;;  %v841_v35 = vmul.f32 -1.442695, %v205_v33 }
  0xea   : > { %968 = vpow2.f32 %v837_v34 }
  0xeb   : > { %970 = vpow2.f32 %v841_v35 }
  0xee   : > { %v217_v36 = vpop.f32.mrf.mxu2  ;;  %v229_v37 = vpop.f32.mrf.mxu3 }
  0xef   : > { %v845_v38 = vmul.f32 -1.442695, %v217_v36  ;;  %v849_v39 = vmul.f32 -1.442695, %v229_v37  ;;  %v196_v40 = vpop.f32.mrf.mxu0  ;;  %v208_v41 = vpop.f32.mrf.mxu1 }
  0xf0   : > { %v969_v42 = vpop.eup %968  ;;  %v838_v45 = vmul.f32 -1.442695, %v196_v40  ;;  %v842_v47 = vmul.f32 -1.442695, %v208_v41 }
  0xf1   : > { %v971_v43 = vpop.eup %970  ;;  %v289_v44 = vadd.f32 1.0, %v969_v42  ;;  %972 = vpow2.f32 %v845_v38 }
  0xf2   : > { %v293_v46 = vadd.f32 1.0, %v971_v43  ;;  %974 = vpow2.f32 %v849_v39 }
  0xf3   : > { %976 = vrcp.f32 %v289_v44  ;;  %v314_v55 = vand.u32 2147483647, %v289_v44  ;;  %v316_v56 = vand.u32 2147483648, %v289_v44  ;;  %vm310_vm0 = vweird.f32 %v289_v44 }
  0xf4   : > { %978 = vrcp.f32 %v293_v46  ;;  %v374_v57 = vand.u32 2147483647, %v293_v46  ;;  %v376_v63 = vand.u32 2147483648, %v293_v46  ;;  %vm370_vm1 = vweird.f32 %v293_v46 }
  0xf5   : > { %980 = vpow2.f32 %v838_v45  ;;  %vm1258_vm2 = vcmp.eq.f32.partialorder %v314_v55, 8.507059e+37  ;;  %v317_v4 = vor.u32 1.1754944e-38, %v316_v56 }
  0xf6   : > { %982 = vpow2.f32 %v842_v47  ;;  %v220_v48 = vpop.f32.mrf.mxu2  ;;  %v232_v53 = vpop.f32.mrf.mxu3  ;;  %vm1262_vm3 = vcmp.eq.f32.partialorder %v374_v57, 8.507059e+37  ;;  %v377_v13 = vor.u32 1.1754944e-38, %v376_v63 }
  0xf7   : > { %v973_v49 = vpop.eup %972  ;;  %v846_v50 = vmul.f32 -1.442695, %v220_v48  ;;  %v850_v0 = vmul.f32 -1.442695, %v232_v53  ;;  %v199_v7 = vpop.f32.mrf.mxu0 }
  0xf8   : > { %v975_v51 = vpop.eup %974  ;;  %v1252_v52 = vadd.f32 1.0, %v973_v49  ;;  %v211_v11 = vpop.f32.mrf.mxu1  ;;  %v839_v17 = vmul.f32 -1.442695, %v199_v7 }
  0xf9   : > { %v977_v54 = vpop.eup %976  ;;  %v1254_v58 = vadd.f32 1.0, %v975_v51  ;;  %v1275_v21 = vmul.f32 -1.442695, %v211_v11 }
  0xfa   : > { %v979_v59 = vpop.eup %978  ;;  %v306_v60 = vmul.f32 %v977_v54, %v289_v44  ;;  %984 = vrcp.f32 %v1252_v52  ;;  %vm311_vm4 = vweird.f32 %v977_v54  ;;  %v434_v16 = vand.u32 2147483647, %v1252_v52 }
  0xfb   : > { %v981_v61 = vpop.eup %980  ;;  %v366_v62 = vmul.f32 %v979_v59, %v293_v46  ;;  %986 = vpow2.f32 %v846_v50  ;;  %vm371_vm5 = vweird.f32 %v979_v59  ;;  %vm312_vm6 = vmor %vm310_vm0, %vm311_vm4  ;;  %vm430_vm7 = vweird.f32 %v1252_v52 }
  0xfc   : > { %v983_v1 = vpop.eup %982  ;;  %v307_v2 = vsub.f32 1.0, %v306_v60  ;;  %988 = vrcp.f32 %v1254_v58  ;;  %v1266_v9 = vadd.f32 1.0, %v981_v61  ;;  %vm372_vm8 = vmor %vm370_vm1, %vm371_vm5  ;;  %v436_v24 = vand.u32 2147483648, %v1252_v52 }
  0xfd   : > { %v367_v5 = vsub.f32 1.0, %v366_v62  ;;  %v1268_v10 = vadd.f32 1.0, %v983_v1  ;;  %990 = vpow2.f32 %v850_v0  ;;  %v494_v25 = vand.u32 2147483647, %v1254_v58 }
  0xfe   : > { %v308_v8 = vmul.f32 %v977_v54, %v307_v2  ;;  %992 = vrcp.f32 %v1266_v9  ;;  %vm1287_vm9 = vcmp.eq.f32.partialorder %v434_v16, 8.507059e+37  ;;  %vm490_vm10 = vweird.f32 %v1254_v58  ;;  %v223_v37 = vpop.f32.mrf.mxu2 }
  0xff   : > { %v368_v12 = vmul.f32 %v979_v59, %v367_v5  ;;  %994 = vrcp.f32 %v1268_v10  ;;  %v496_v32 = vand.u32 2147483648, %v1254_v58  ;;  %v437_v39 = vor.u32 1.1754944e-38, %v436_v24  ;;  %v202_v5 = vpop.f32.mrf.mxu0 }
 0x100   : > { %v985_v14 = vpop.eup %984  ;;  %v309_v15 = vadd.f32 %v977_v54, %v308_v8  ;;  %vm1296_vm13 = vcmp.eq.f32.partialorder %v494_v25, 8.507059e+37  ;;  %996 = vpow2.f32 %v839_v17  ;;  %vm325_vm15 = vweird.f32 %v1266_v9 }
 0x101   : > { %v987_v18 = vpop.eup %986  ;;  %v369_v19 = vadd.f32 %v979_v59, %v368_v12  ;;  %v426_v20 = vmul.f32 %v985_v14, %v1252_v52  ;;  %vm431_vm11 = vweird.f32 %v985_v14  ;;  %v497_v46 = vor.u32 1.1754944e-38, %v496_v32  ;;  %v214_v12 = vpop.f32.mrf.mxu1 }
 0x102   : > { %v989_v22 = vpop.eup %988  ;;  %v313_v23 = vsel %vm312_vm6, %v977_v54, %v309_v15  ;;  %v1294_v36 = vadd.f32 1.0, %v987_v18  ;;  %vm432_vm14 = vmor %vm430_vm7, %vm431_vm11  ;;  %v847_v47 = vmul.f32 -1.442695, %v223_v37  ;;  %v329_v52 = vand.u32 2147483647, %v1266_v9 }
 0x103   : > { %v318_v26 = vsel %vm1258_vm2, %v317_v4, %v313_v23  ;;  %v373_v27 = vsel %vm372_vm8, %v979_v59, %v369_v19  ;;  %v427_v28 = vsub.f32 1.0, %v426_v20  ;;  %v486_v29 = vmul.f32 %v989_v22, %v1254_v58  ;;  %v991_v33 = vpop.eup %990  ;;  %v235_v59 = vpop.f32.mrf.mxu3 }
 0x104   : > { %545 = vst [vmem:[#allocation2 + $0x30] sm:$0xff] %v318_v26  ;;  %v378_v30 = vsel %vm1262_vm3, %v377_v13, %v373_v27  ;;  %v993_v38 = vpop.eup %992  ;;  %vm491_vm12 = vweird.f32 %v989_v22  ;;  %v1302_v44 = vadd.f32 1.0, %v991_v33  ;;  %998 = vrcp.f32 %v1294_v36 }
 0x105   : > { %577 = vst [vmem:[%s1202_s17] sm:$0xff] %v318_v26  ;;  %v428_v34 = vmul.f32 %v985_v14, %v427_v28  ;;  %v487_v35 = vsub.f32 1.0, %v486_v29  ;;  %v321_v43 = vmul.f32 %v993_v38, %v1266_v9  ;;  %v995_v45 = vpop.eup %994  ;;  %vm492_vm0 = vmor %vm490_vm10, %vm491_vm12  ;;  %vm326_vm1 = vweird.f32 %v993_v38 }
 0x106   : > { %549 = vst [vmem:[#allocation2 + $0x50] sm:$0xff] %v378_v30  ;;  %v381_v51 = vmul.f32 %v995_v45, %v1268_v10  ;;  %v331_v54 = vand.u32 2147483648, %v1266_v9  ;;  %1000 = vrcp.f32 %v1302_v44  ;;  %v997_v60 = vpop.eup %996  ;;  %vm385_vm2 = vweird.f32 %v1268_v10  ;;  %vm327_vm4 = vmor %vm325_vm15, %vm326_vm1  ;;  %v226_v19 = vpop.f32.mrf.mxu2 }
 0x107   : > { %581 = vst [vmem:[%s1202_s17 + $0x20] sm:$0xff] %v378_v30  ;;  %v429_v41 = vadd.f32 %v985_v14, %v428_v34  ;;  %v488_v42 = vmul.f32 %v989_v22, %v487_v35  ;;  %v322_v50 = vsub.f32 1.0, %v321_v43  ;;  %v389_v58 = vand.u32 2147483647, %v1268_v10 }
 0x108   : > { %v382_v57 = vsub.f32 1.0, %v381_v51  ;;  %v391_v62 = vand.u32 2147483648, %v1268_v10  ;;  %vm386_vm3 = vweird.f32 %v995_v45  ;;  %v1324_v1 = vadd.f32 1.0, %v997_v60 }
 0x109   : > { %v433_v48 = vsel %vm432_vm14, %v985_v14, %v429_v41  ;;  %v489_v49 = vadd.f32 %v989_v22, %v488_v42  ;;  %v323_v56 = vmul.f32 %v993_v38, %v322_v50  ;;  %vm330_vm5 = vcmp.eq.f32.partialorder %v329_v52, 8.507059e+37  ;;  %vm387_vm6 = vmor %vm385_vm2, %vm386_vm3 }
 0x10a   : > { %v438_v53 = vsel %vm1287_vm9, %v437_v39, %v433_v48  ;;  %v383_v0 = vmul.f32 %v995_v45, %v382_v57  ;;  %v999_v2 = vpop.eup %998  ;;  %v332_v3 = vor.u32 1.1754944e-38, %v331_v54  ;;  %1002 = vpow2.f32 %v1275_v21 }
 0x10b   : > { %553 = vst [vmem:[#allocation2 + $0x40] sm:$0xff] %v438_v53  ;;  %v493_v55 = vsel %vm492_vm0, %v989_v22, %v489_v49  ;;  %v324_v63 = vadd.f32 %v993_v38, %v323_v56  ;;  %v851_v4 = vmul.f32 -1.442695, %v235_v59  ;;  %v441_v8 = vmul.f32 %v999_v2, %v1294_v36 }
 0x10c   : > { %585 = vst [vmem:[%s1202_s17 + $0x40] sm:$0xff] %v438_v53  ;;  %v498_v61 = vsel %vm1296_vm13, %v497_v46, %v493_v55  ;;  %v384_v7 = vadd.f32 %v995_v45, %v383_v0  ;;  %v449_v11 = vand.u32 2147483647, %v1294_v36  ;;  %vm390_vm7 = vcmp.eq.f32.partialorder %v389_v58, 8.507059e+37  ;;  %v1001_v14 = vpop.eup %1000 }
 0x10d   : > { %557 = vst [vmem:[#allocation2 + $0x60] sm:$0xff] %v498_v61  ;;  %v328_v6 = vsel %vm327_vm4, %v993_v38, %v324_v63  ;;  %v392_v9 = vor.u32 1.1754944e-38, %v391_v62  ;;  %1004 = vrcp.f32 %v1324_v1  ;;  %v442_v16 = vsub.f32 1.0, %v441_v8 }
 0x10e   : > { %589 = vst [vmem:[%s1202_s17 + $0x60] sm:$0xff] %v498_v61  ;;  %v333_v13 = vsel %vm330_vm5, %v332_v3, %v328_v6  ;;  %v388_v15 = vsel %vm387_vm6, %v995_v45, %v384_v7  ;;  %v451_v17 = vand.u32 2147483648, %v1294_v36  ;;  %v840_v18 = vmul.f32 -1.442695, %v202_v5 }
 0x10f   : > { %546 = vst [vmem:[#allocation2] sm:$0xff] %v333_v13  ;;  %v393_v20 = vsel %vm390_vm7, %v392_v9, %v388_v15  ;;  %v501_v21 = vmul.f32 %v1001_v14, %v1302_v44  ;;  %1006 = vpow2.f32 %v847_v47  ;;  %v844_v10 = vmul.f32 -1.442695, %v214_v12 }
 0x110   : > { %578 = vst [vmem:[%s1202_s17 + $0x8] sm:$0xff] %v333_v13  ;;  %v443_v22 = vmul.f32 %v999_v2, %v442_v16  ;;  %vm446_vm8 = vweird.f32 %v999_v2  ;;  %vm1340_vm9 = vcmp.eq.f32.partialorder %v449_v11, 8.507059e+37  ;;  %1008 = vpow2.f32 %v851_v4  ;;  %v1003_v24 = vpop.eup %1002 }
 0x111   : > { %550 = vst [vmem:[#allocation2 + $0x68] sm:$0xff] %v393_v20  ;;  %vm445_vm10 = vweird.f32 %v1294_v36  ;;  %v502_v25 = vsub.f32 1.0, %v501_v21  ;;  %v509_v26 = vand.u32 2147483647, %v1302_v44  ;;  %v848_v27 = vmul.f32 -1.442695, %v226_v19 }
 0x112   : > { %582 = vst [vmem:[%s1202_s17 + $0x28] sm:$0xff] %v393_v20  ;;  %v444_v28 = vadd.f32 %v999_v2, %v443_v22  ;;  %v511_v29 = vand.u32 2147483648, %v1302_v44  ;;  %v1348_v30 = vadd.f32 1.0, %v1003_v24  ;;  %1010 = vpow2.f32 %v840_v18  ;;  %vm447_vm11 = vmor %vm445_vm10, %vm446_vm8 }
 0x113   : > { %v1005_v31 = vpop.eup %1004  ;;  %v452_v32 = vor.u32 1.1754944e-38, %v451_v17  ;;  %v503_v33 = vmul.f32 %v1001_v14, %v502_v25  ;;  %vm506_vm12 = vweird.f32 %v1001_v14  ;;  %1012 = vpow2.f32 %v844_v10 }
 0x114   : > { %v448_v34 = vsel %vm447_vm11, %v999_v2, %v444_v28  ;;  %vm505_vm13 = vweird.f32 %v1302_v44  ;;  %v336_v35 = vmul.f32 %v1005_v31, %v1324_v1  ;;  %1014 = vrcp.f32 %v1348_v30  ;;  %v238_v44 = vpop.f32.mrf.mxu3 }
 0x115   : > { %v1007_v36 = vpop.eup %1006  ;;  %v453_v37 = vsel %vm1340_vm9, %v452_v32, %v448_v34  ;;  %v504_v38 = vadd.f32 %v1001_v14, %v503_v33  ;;  %vm1355_vm14 = vcmp.eq.f32.partialorder %v509_v26, 8.507059e+37  ;;  %1016 = vpow2.f32 %v848_v27  ;;  %vm507_vm15 = vmor %vm505_vm13, %vm506_vm12 }
 0x116   : > { %v1009_v40 = vpop.eup %1008  ;;  %554 = vst [vmem:[#allocation2 + $0x20] sm:$0xff] %v453_v37  ;;  %v512_v41 = vor.u32 1.1754944e-38, %v511_v29  ;;  %v337_v42 = vsub.f32 1.0, %v336_v35  ;;  %vm340_vm0 = vweird.f32 %v1324_v1  ;;  %v1360_v43 = vadd.f32 1.0, %v1007_v36 }
 0x117   : > { %586 = vst [vmem:[%s1202_s17 + $0x48] sm:$0xff] %v453_v37  ;;  %v508_v45 = vsel %vm507_vm15, %v1001_v14, %v504_v38  ;;  %v344_v46 = vand.u32 2147483647, %v1324_v1  ;;  %v346_v47 = vand.u32 2147483648, %v1324_v1  ;;  %v1365_v48 = vadd.f32 1.0, %v1009_v40 }
 0x118   : > { %v1011_v49 = vpop.eup %1010  ;;  %v513_v50 = vsel %vm1355_vm14, %v512_v41, %v508_v45  ;;  %v338_v51 = vmul.f32 %v1005_v31, %v337_v42  ;;  %vm341_vm1 = vweird.f32 %v1005_v31  ;;  %1018 = vrcp.f32 %v1360_v43 }
 0x119   : > { %v1013_v53 = vpop.eup %1012  ;;  %558 = vst [vmem:[#allocation2 + $0x70] sm:$0xff] %v513_v50  ;;  %1020 = vrcp.f32 %v1365_v48  ;;  %v852_v52 = vmul.f32 -1.442695, %v238_v44  ;;  %vm342_vm2 = vmor %vm340_vm0, %vm341_vm1  ;;  %vm345_vm3 = vcmp.eq.f32.partialorder %v344_v46, 8.507059e+37  ;;  %v347_v57 = vor.u32 1.1754944e-38, %v346_v47 }
 0x11a   : > { %v1015_v54 = vpop.eup %1014  ;;  %590 = vst [vmem:[%s1202_s17 + $0x68] sm:$0xff] %v513_v50  ;;  %v339_v55 = vadd.f32 %v1005_v31, %v338_v51  ;;  %vm400_vm4 = vweird.f32 %v1348_v30  ;;  %v404_v61 = vand.u32 2147483647, %v1348_v30  ;;  %v406_v58 = vand.u32 2147483648, %v1348_v30 }
 0x11b   : > { %v1017_v56 = vpop.eup %1016  ;;  %v396_v59 = vmul.f32 %v1015_v54, %v1348_v30  ;;  %v1378_v62 = vadd.f32 1.0, %v1011_v49  ;;  %v1380_v2 = vadd.f32 1.0, %v1013_v53  ;;  %1022 = vpow2.f32 %v852_v52 }
 0x11c   : > { %v343_v60 = vsel %vm342_vm2, %v1005_v31, %v339_v55  ;;  %v464_v3 = vand.u32 2147483647, %v1360_v43  ;;  %v466_v4 = vand.u32 2147483648, %v1360_v43  ;;  %v1385_v5 = vadd.f32 1.0, %v1017_v56 }
 0x11d   : > { %v348_v63 = vsel %vm345_vm3, %v347_v57, %v343_v60  ;;  %v397_v0 = vsub.f32 1.0, %v396_v59  ;;  %1024 = vrcp.f32 %v1378_v62  ;;  %vm401_vm5 = vweird.f32 %v1015_v54 }
 0x11e   : > { %v1019_v1 = vpop.eup %1018  ;;  %547 = vst [vmem:[#allocation2 + $0x58] sm:$0xff] %v348_v63  ;;  %1026 = vrcp.f32 %v1380_v2  ;;  %vm1390_vm6 = vcmp.eq.f32.partialorder %v404_v61, 8.507059e+37  ;;  %v407_v12 = vor.u32 1.1754944e-38, %v406_v58  ;;  %v524_v9 = vand.u32 2147483647, %v1365_v48  ;;  %vm402_vm8 = vmor %vm400_vm4, %vm401_vm5 }
 0x11f   : > { %v1021_v6 = vpop.eup %1020  ;;  %579 = vst [vmem:[%s1202_s17 + $0x10] sm:$0xff] %v348_v63  ;;  %v398_v7 = vmul.f32 %v1015_v54, %v397_v0  ;;  %v456_v8 = vmul.f32 %v1019_v1, %v1360_v43  ;;  %vm460_vm7 = vweird.f32 %v1360_v43  ;;  %v526_v16 = vand.u32 2147483648, %v1365_v48 }
 0x120   : > { %v516_v13 = vmul.f32 %v1021_v6, %v1365_v48  ;;  %vm1400_vm9 = vcmp.eq.f32.partialorder %v464_v3, 8.507059e+37  ;;  %vm520_vm10 = vweird.f32 %v1365_v48  ;;  %1028 = vrcp.f32 %v1385_v5 }
 0x121   : > { %v399_v14 = vadd.f32 %v1015_v54, %v398_v7  ;;  %v457_v15 = vsub.f32 1.0, %v456_v8  ;;  %v1023_v19 = vpop.eup %1022  ;;  %vm461_vm11 = vweird.f32 %v1019_v1  ;;  %v467_v10 = vor.u32 1.1754944e-38, %v466_v4 }
 0x122   : > { %v517_v18 = vsub.f32 1.0, %v516_v13  ;;  %vm521_vm12 = vweird.f32 %v1021_v6  ;;  %vm1408_vm13 = vcmp.eq.f32.partialorder %v524_v9, 8.507059e+37  ;;  %v527_v28 = vor.u32 1.1754944e-38, %v526_v16  ;;  %vm462_vm15 = vmor %vm460_vm7, %vm461_vm11 }
 0x123   : > { %v403_v20 = vsel %vm402_vm8, %v1015_v54, %v399_v14  ;;  %v458_v21 = vmul.f32 %v1019_v1, %v457_v15  ;;  %v1025_v22 = vpop.eup %1024  ;;  %vm355_vm14 = vweird.f32 %v1378_v62  ;;  %v359_v31 = vand.u32 2147483647, %v1378_v62  ;;  %vm522_vm0 = vmor %vm520_vm10, %vm521_vm12 }
 0x124   : > { %v408_v23 = vsel %vm1390_vm6, %v407_v12, %v403_v20  ;;  %v518_v24 = vmul.f32 %v1021_v6, %v517_v18  ;;  %v1027_v26 = vpop.eup %1026  ;;  %v351_v29 = vmul.f32 %v1025_v22, %v1378_v62  ;;  %v361_v32 = vand.u32 2147483648, %v1378_v62 }
 0x125   : > { %551 = vst [vmem:[#allocation2 + $0x8] sm:$0xff] %v408_v23  ;;  %v459_v27 = vadd.f32 %v1019_v1, %v458_v21  ;;  %v411_v33 = vmul.f32 %v1027_v26, %v1380_v2  ;;  %vm415_vm1 = vweird.f32 %v1380_v2  ;;  %v304_v36 = vadd.f32 1.0, %v1023_v19 }
 0x126   : > { %583 = vst [vmem:[%s1202_s17 + $0x30] sm:$0xff] %v408_v23  ;;  %v519_v30 = vadd.f32 %v1021_v6, %v518_v24  ;;  %v352_v35 = vsub.f32 1.0, %v351_v29  ;;  %v1029_v37 = vpop.eup %1028  ;;  %v421_v41 = vand.u32 2147483648, %v1380_v2  ;;  %vm356_vm2 = vweird.f32 %v1025_v22 }
 0x127   : > { %v463_v34 = vsel %vm462_vm15, %v1019_v1, %v459_v27  ;;  %v412_v40 = vsub.f32 1.0, %v411_v33  ;;  %v471_v44 = vmul.f32 %v1029_v37, %v1385_v5  ;;  %vm416_vm3 = vweird.f32 %v1027_v26  ;;  %vm357_vm5 = vmor %vm355_vm14, %vm356_vm2 }
 0x128   : > { %v468_v38 = vsel %vm1400_vm9, %v467_v10, %v463_v34  ;;  %v523_v39 = vsel %vm522_vm0, %v1021_v6, %v519_v30  ;;  %v353_v43 = vmul.f32 %v1025_v22, %v352_v35  ;;  %v419_v46 = vand.u32 2147483647, %v1380_v2  ;;  %vm417_vm6 = vmor %vm415_vm1, %vm416_vm3 }
 0x129   : > { %555 = vst [vmem:[#allocation2 + $0x10] sm:$0xff] %v468_v38  ;;  %v528_v42 = vsel %vm1408_vm13, %v527_v28, %v523_v39  ;;  %v413_v45 = vmul.f32 %v1027_v26, %v412_v40  ;;  %1030 = vrcp.f32 %v304_v36  ;;  %vm360_vm4 = vcmp.eq.f32.partialorder %v359_v31, 8.507059e+37 }
 0x12a   : > { %587 = vst [vmem:[%s1202_s17 + $0x50] sm:$0xff] %v468_v38  ;;  %v354_v47 = vadd.f32 %v1025_v22, %v353_v43  ;;  %v472_v48 = vsub.f32 1.0, %v471_v44  ;;  %v362_v49 = vor.u32 1.1754944e-38, %v361_v32  ;;  %v479_v51 = vand.u32 2147483647, %v1385_v5 }
 0x12b   : > { %559 = vst [vmem:[#allocation2 + $0x78] sm:$0xff] %v528_v42  ;;  %v414_v50 = vadd.f32 %v1027_v26, %v413_v45  ;;  %v481_v53 = vand.u32 2147483648, %v1385_v5  ;;  %v422_v54 = vor.u32 1.1754944e-38, %v421_v41  ;;  %vm476_vm7 = vweird.f32 %v1029_v37 }
 0x12c   : > { %591 = vst [vmem:[%s1202_s17 + $0x70] sm:$0xff] %v528_v42  ;;  %v358_v52 = vsel %vm357_vm5, %v1025_v22, %v354_v47  ;;  %v473_v55 = vmul.f32 %v1029_v37, %v472_v48  ;;  %vm420_vm8 = vcmp.eq.f32.partialorder %v419_v46, 8.507059e+37  ;;  %vm475_vm9 = vweird.f32 %v1385_v5 }
 0x12d   : > { %v363_v56 = vsel %vm360_vm4, %v362_v49, %v358_v52  ;;  %v418_v57 = vsel %vm417_vm6, %v1027_v26, %v414_v50  ;;  %vm477_vm10 = vmor %vm475_vm9, %vm476_vm7  ;;  %v482_v58 = vor.u32 1.1754944e-38, %v481_v53  ;;  %vm480_vm11 = vcmp.eq.f32.partialorder %v479_v51, 8.507059e+37 }
 0x12e   : > { %548 = vst [vmem:[#allocation2 + $0x18] sm:$0xff] %v363_v56  ;;  %v423_v59 = vsel %vm420_vm8, %v422_v54, %v418_v57  ;;  %v474_v60 = vadd.f32 %v1029_v37, %v473_v55  ;;  %v541_v1 = vand.u32 2147483648, %v304_v36  ;;  %v539_v4 = vand.u32 2147483647, %v304_v36 }
 0x12f   : > { %v1031_v61 = vpop.eup %1030  ;;  %580 = vst [vmem:[%s1202_s17 + $0x18] sm:$0xff] %v363_v56  ;;  %vm535_vm13 = vweird.f32 %v304_v36 }
 0x130   : > { %552 = vst [vmem:[#allocation2 + $0x48] sm:$0xff] %v423_v59  ;;  %v478_v62 = vsel %vm477_vm10, %v1029_v37, %v474_v60  ;;  %v531_v63 = vmul.f32 %v1031_v61, %v304_v36  ;;  %vm536_vm12 = vweird.f32 %v1031_v61  ;;  %v542_v5 = vor.u32 1.1754944e-38, %v541_v1 }
 0x131   : > { %584 = vst [vmem:[%s1202_s17 + $0x38] sm:$0xff] %v423_v59  ;;  %v483_v0 = vsel %vm480_vm11, %v482_v58, %v478_v62  ;;  %vm537_vm14 = vmor %vm535_vm13, %vm536_vm12  ;;  %vm540_vm15 = vcmp.eq.f32.partialorder %v539_v4, 8.507059e+37 }
 0x132   : > { %556 = vst [vmem:[#allocation2 + $0x38] sm:$0xff] %v483_v0  ;;  %v532_v2 = vsub.f32 1.0, %v531_v63 }
 0x133   : > { %588 = vst [vmem:[%s1202_s17 + $0x58] sm:$0xff] %v483_v0 }
 0x134   : > { %v533_v3 = vmul.f32 %v1031_v61, %v532_v2 }
 0x136   : > { %v534_v6 = vadd.f32 %v1031_v61, %v533_v3 }
 0x138   : > { %v538_v7 = vsel %vm537_vm14, %v1031_v61, %v534_v6 }
 0x139   : > { %v543_v8 = vsel %vm540_vm15, %v542_v5, %v538_v7 }
 0x13a   : > { %560 = vst [vmem:[#allocation2 + $0x28] sm:$0xff] %v543_v8 }
 0x13b   : > { %592 = vst [vmem:[%s1202_s17 + $0x78] sm:$0xff] %v543_v8 }
 0x13c PF: > { %p853_p10 = scmp.ne.s32.totalorder %s1096_s22, 1 }
 0x13e   : > { %596 = sbr.rel (%p853_p10) target bundleno = 610 (0x262), region = 32 }
 0x143   : > { %v597_v11 = vld [vmem:[#allocation2 + $0x30] sm:$0xff]  ;;  %v598_v12 = vld [vmem:[#allocation2] sm:$0xff]  ;;  %v599_v13 = vld [vmem:[#allocation2 + $0x58] sm:$0xff] }
 0x144   : > { %613 = vxpose.xlu0.b32.start [1/16] %v597_v11, 128  ;;  %v600_v9 = vld [vmem:[#allocation2 + $0x18] sm:$0xff]  ;;  %v601_v14 = vld [vmem:[#allocation2 + $0x50] sm:$0xff]  ;;  %v602_v15 = vld [vmem:[#allocation2 + $0x68] sm:$0xff] }
 0x145   : > { %v603_v16 = vld [vmem:[#allocation2 + $0x8] sm:$0xff]  ;;  %v605_v18 = vld [vmem:[#allocation2 + $0x40] sm:$0xff]  ;;  %v607_v20 = vld [vmem:[#allocation2 + $0x10] sm:$0xff] }
 0x146   : > { %v604_v17 = vld [vmem:[#allocation2 + $0x48] sm:$0xff]  ;;  %v606_v19 = vld [vmem:[#allocation2 + $0x20] sm:$0xff]  ;;  %v608_v21 = vld [vmem:[#allocation2 + $0x38] sm:$0xff] }
 0x147   : > { %v609_v10 = vld [vmem:[#allocation2 + $0x60] sm:$0xff]  ;;  %v610_v22 = vld [vmem:[#allocation2 + $0x70] sm:$0xff]  ;;  %v611_v23 = vld [vmem:[#allocation2 + $0x78] sm:$0xff] }
 0x148   : > { %v612_v24 = vld [vmem:[#allocation2 + $0x28] sm:$0xff] }
 0x14c   : > { %614 = vxpose.xlu0.b32.cont [2/16] %v598_v12, 128 }
 0x154   : > { %615 = vxpose.xlu0.b32.cont [3/16] %v599_v13, 128 }
 0x15c   : > { %616 = vxpose.xlu0.b32.cont [4/16] %v600_v9, 128 }
 0x164   : > { %617 = vxpose.xlu0.b32.cont [5/16] %v601_v14, 128 }
 0x16c   : > { %618 = vxpose.xlu0.b32.cont [6/16] %v602_v15, 128 }
 0x174   : > { %619 = vxpose.xlu0.b32.cont [7/16] %v603_v16, 128 }
 0x17c   : > { %620 = vxpose.xlu0.b32.cont [8/16] %v604_v17, 128 }
 0x184   : > { %621 = vxpose.xlu0.b32.cont [9/16] %v605_v18, 128 }
 0x18c   : > { %622 = vxpose.xlu0.b32.cont [10/16] %v606_v19, 128 }
 0x194   : > { %623 = vxpose.xlu0.b32.cont [11/16] %v607_v20, 128 }
 0x19c   : > { %624 = vxpose.xlu0.b32.cont [12/16] %v608_v21, 128 }
 0x1a4   : > { %625 = vxpose.xlu0.b32.cont [13/16] %v609_v10, 128 }
 0x1ac   : > { %626 = vxpose.xlu0.b32.cont [14/16] %v610_v22, 128 }
 0x1b4   : > { %627 = vxpose.xlu0.b32.cont [15/16] %v611_v23, 128 }
 0x1bc   : > { %628 = vxpose.xlu0.b32.end [16/16] %v612_v24, 128 }
 0x1e8   : > { %v629_v25 = vpop.trf.xlu0 }
 0x1e9   : > { %645 = vst [vmem:[%s1202_s17] sm:$0xff] %v629_v25 }
 0x1f0   : > { %v630_v26 = vpop.trf.xlu0 }
 0x1f1   : > { %646 = vst [vmem:[%s1202_s17 + $0x8] sm:$0xff] %v630_v26 }
 0x1f8   : > { %v631_v27 = vpop.trf.xlu0 }
 0x1f9   : > { %647 = vst [vmem:[%s1202_s17 + $0x10] sm:$0xff] %v631_v27 }
 0x200   : > { %v632_v28 = vpop.trf.xlu0 }
 0x201   : > { %648 = vst [vmem:[%s1202_s17 + $0x18] sm:$0xff] %v632_v28 }
 0x208   : > { %v633_v29 = vpop.trf.xlu0 }
 0x209   : > { %649 = vst [vmem:[%s1202_s17 + $0x20] sm:$0xff] %v633_v29 }
 0x210   : > { %v634_v30 = vpop.trf.xlu0 }
 0x211   : > { %650 = vst [vmem:[%s1202_s17 + $0x28] sm:$0xff] %v634_v30 }
 0x218   : > { %v635_v31 = vpop.trf.xlu0 }
 0x219   : > { %651 = vst [vmem:[%s1202_s17 + $0x30] sm:$0xff] %v635_v31 }
 0x220   : > { %v636_v32 = vpop.trf.xlu0 }
 0x221   : > { %652 = vst [vmem:[%s1202_s17 + $0x38] sm:$0xff] %v636_v32 }
 0x228   : > { %v637_v33 = vpop.trf.xlu0 }
 0x229   : > { %653 = vst [vmem:[%s1202_s17 + $0x40] sm:$0xff] %v637_v33 }
 0x230   : > { %v638_v34 = vpop.trf.xlu0 }
 0x231   : > { %654 = vst [vmem:[%s1202_s17 + $0x48] sm:$0xff] %v638_v34 }
 0x238   : > { %v639_v35 = vpop.trf.xlu0 }
 0x239   : > { %655 = vst [vmem:[%s1202_s17 + $0x50] sm:$0xff] %v639_v35 }
 0x240   : > { %v640_v36 = vpop.trf.xlu0 }
 0x241   : > { %656 = vst [vmem:[%s1202_s17 + $0x58] sm:$0xff] %v640_v36 }
 0x248   : > { %v641_v37 = vpop.trf.xlu0 }
 0x249   : > { %657 = vst [vmem:[%s1202_s17 + $0x60] sm:$0xff] %v641_v37 }
 0x250   : > { %v642_v38 = vpop.trf.xlu0 }
 0x251   : > { %658 = vst [vmem:[%s1202_s17 + $0x68] sm:$0xff] %v642_v38 }
 0x258   : > { %v643_v39 = vpop.trf.xlu0 }
 0x259   : > { %659 = vst [vmem:[%s1202_s17 + $0x70] sm:$0xff] %v643_v39 }
 0x260   : > { %v644_v40 = vpop.trf.xlu0 }
 0x261   : > { %660 = vst [vmem:[%s1202_s17 + $0x78] sm:$0xff] %v644_v40 }
 0x262 PF: > { %667 = sbr.rel (!%p1189_p4) target bundleno = 638 (0x27e), region = 36  ;;  %s855_s9 = sshll.u32 (%p1189_p4), %s1100_s0, 1  ;;  %v735_v41 = vld [vmem:[%s1202_s17] sm:$0xff] (%p1189_p4)  ;;  %v737_v42 = vld [vmem:[%s1202_s17 + $0x8] sm:$0xff] (%p1189_p4)  ;;  %v739_v43 = vld [vmem:[%s1202_s17 + $0x10] sm:$0xff] (%p1189_p4) }
 0x263   : > { %s669_s10 = sadd.s32 (%p1189_p4), %s1096_s22, %s855_s9  ;;  %v741_v44 = vld [vmem:[%s1202_s17 + $0x18] sm:$0xff] (%p1189_p4)  ;;  %v743_v45 = vld [vmem:[%s1202_s17 + $0x20] sm:$0xff] (%p1189_p4)  ;;  %v745_v46 = vld [vmem:[%s1202_s17 + $0x28] sm:$0xff] (%p1189_p4) }
 0x264   : > { %s670_s11 = sld [smem:[#allocation4 + %s669_s10]] (%p1189_p4)  ;;  %v747_v47 = vld [vmem:[%s1202_s17 + $0x30] sm:$0xff] (%p1189_p4)  ;;  %v749_v48 = vld [vmem:[%s1202_s17 + $0x38] sm:$0xff] (%p1189_p4)  ;;  %v751_v49 = vld [vmem:[%s1202_s17 + $0x40] sm:$0xff] (%p1189_p4) }
 0x265   : > { %s671_s12 = sld [smem:[#allocation5 + %s669_s10]] (%p1189_p4)  ;;  %v753_v50 = vld [vmem:[%s1202_s17 + $0x48] sm:$0xff] (%p1189_p4)  ;;  %v755_v51 = vld [vmem:[%s1202_s17 + $0x50] sm:$0xff] (%p1189_p4)  ;;  %v757_v53 = vld [vmem:[%s1202_s17 + $0x58] sm:$0xff] (%p1189_p4) }
 0x266   : > { %v759_v52 = vld [vmem:[%s1202_s17 + $0x60] sm:$0xff] (%p1189_p4)  ;;  %v761_v54 = vld [vmem:[%s1202_s17 + $0x68] sm:$0xff] (%p1189_p4)  ;;  %v763_v55 = vld [vmem:[%s1202_s17 + $0x70] sm:$0xff] (%p1189_p4) }
 0x268   : > { %v765_v56 = vld [vmem:[%s1202_s17 + $0x78] sm:$0xff] }
 0x26a   : > { %s861_s13 = sshll.u32 %s670_s11, 5 }
 0x26b   : > { %s674_s15 = sadd.s32 %s861_s13, %s671_s12 }
 0x26c   : > { %s858_s4 = sshll.u32 %s674_s15, 3 }
 0x26d   : > { %s676_s19 = scalar_lea.vmem %s1507_s3, %s858_s4 }
 0x26e   : > { %736 = vst [vmem:[%s676_s19] sm:$0xff] %v735_v41 }
 0x26f   : > { %738 = vst [vmem:[%s676_s19 + $0x10] sm:$0xff] %v737_v42 }
 0x270   : > { %740 = vst [vmem:[%s676_s19 + $0x20] sm:$0xff] %v739_v43 }
 0x271   : > { %742 = vst [vmem:[%s676_s19 + $0x30] sm:$0xff] %v741_v44 }
 0x272   : > { %744 = vst [vmem:[%s676_s19 + $0x40] sm:$0xff] %v743_v45 }
 0x273   : > { %746 = vst [vmem:[%s676_s19 + $0x50] sm:$0xff] %v745_v46 }
 0x274   : > { %748 = vst [vmem:[%s676_s19 + $0x60] sm:$0xff] %v747_v47 }
 0x275   : > { %750 = vst [vmem:[%s676_s19 + $0x70] sm:$0xff] %v749_v48 }
 0x276   : > { %752 = vst [vmem:[%s676_s19 + $0x80] sm:$0xff] %v751_v49 }
 0x277   : > { %754 = vst [vmem:[%s676_s19 + $0x90] sm:$0xff] %v753_v50 }
 0x278   : > { %756 = vst [vmem:[%s676_s19 + $0xa0] sm:$0xff] %v755_v51 }
 0x279   : > { %758 = vst [vmem:[%s676_s19 + $0xb0] sm:$0xff] %v757_v53 }
 0x27a   : > { %760 = vst [vmem:[%s676_s19 + $0xc0] sm:$0xff] %v759_v52 }
 0x27b   : > { %762 = vst [vmem:[%s676_s19 + $0xd0] sm:$0xff] %v761_v54 }
 0x27c   : > { %764 = vst [vmem:[%s676_s19 + $0xe0] sm:$0xff] %v763_v55 }
 0x27d   : > { %766 = vst [vmem:[%s676_s19 + $0xf0] sm:$0xff] %v765_v56 }
 0x27e PF: > { %s26_s24 = sadd.s32 1, %s1112_s24   ;;  %s1528_s20 = smov %s1092_s21 }
 0x27f   : > { %p23_p11 = scmp.ge.s32.totalorder %s26_s24, 8   ;;  %s1529_s21 = smov %s1199_s14 }
 0x280   : > { %s1530_s22 = smov %s1104_s23  ;;  %s1531_s0 = smov %s1108_s1 }
 0x281   : > { %s1532_s23 = smov %s1535_s25  ;;  %s1533_s1 = smov %s1539_s26 }
 0x282   :  { %25 = sbr.rel (!%p23_p11) target bundleno = 11 (0xb), region = 99 }

// kernel: adjacency_decoder.4
= control target key start
LH: loop header
LB: loop body
LE: loop exit
PB: predicated region body
PF: predicated region fallthrough
CT: control target
= control target key end

     0   :  { %s1024_s15 = smov 0   ;;  %s1026_s16 = smov 0   ;;  %s1380_s0 = inlined_call_operand.vmem [shape: f32[256,256], index: 0, kind: input, shape index: {}]   ;;  %s1381_s1 = inlined_call_operand.vmem [shape: f32[256,128], index: 1, kind: input, shape index: {}]   ;;  %s1382_s2 = inlined_call_operand.vmem [shape: f32[1,128], index: 2, kind: input, shape index: {}]   ;;  %s1383_s3 = inlined_call_operand.vmem [shape: f32[256,1], index: 3, kind: input, shape index: {}]   ;;  %s1384_s4 = inlined_call_operand.vmem [shape: f32[256,128], index: 4, kind: output, shape index: {}]  }
   0x1   :  { %s1028_s17 = smov 0  }
   0x2 LB: > { %s26_s18 = sadd.s32 1, %s992_s16  ;;  %p902_p0 = scmp.ge.s32.totalorder %s996_s17, 1  ;;  %s996_s17 = sphi %s1028_s17, %s14_s17   ;;  %s992_s16 = sphi %s1026_s16, %s1386_s16   ;;  %s988_s15 = sphi %s1024_s15, %s1385_s15  }
   0x3   : > { %p28_p1 = scmp.ge.s32.totalorder %s26_s18, 2  ;;  %p194_p2 = scmp.lt.s32.totalorder %s996_s17, 3 }
   0x5   : > { %s1388_s18 = smov (%p28_p1, %s26_s18), 0  ;;  %p195_p3 = pnand %p902_p0, %p194_p2 }
   0x6   : > { %s903_s25 = sshll.u32 (!%p195_p3), %s988_s15, 4 }
   0x7   : > { %198 = sbr.rel (%p195_p3) target bundleno = 252 (0xfc), region = 36  ;;  %p232_p4 = scmp.lt.s32.totalorder (!%p195_p3), %s903_s25, 31 }
   0xc   : > { %v291_v0 = vld [vmem:[%s1381_s1 + $0x78] sm:$0xff]  ;;  %v290_v2 = vld [vmem:[%s1381_s1 + $0x70] sm:$0xff]  ;;  %v289_v4 = vld [vmem:[%s1381_s1 + $0x68] sm:$0xff]  ;;  %s1390_s25 = smov (!%p232_p4, %s903_s25), 31  ;;  %v998_v8 = vmov 0  }
   0xd   : > { %v307_v1 = vld [vmem:[%s1381_s1 + $0xf8] sm:$0xff]  ;;  %356 = vmatpush.msra.mxu0 %v291_v0  ;;  %913 = vmatpush.msra.mxu2 %v291_v0  ;;  %v306_v3 = vld [vmem:[%s1381_s1 + $0xf0] sm:$0xff]  ;;  %v305_v5 = vld [vmem:[%s1381_s1 + $0xe8] sm:$0xff]  ;;  %s907_s8 = sshll.u32 %s1390_s25, 3  ;;  %s912_s11 = sshll.u32 %s1390_s25, 4 }
   0xe   : > { %421 = vmatpush.msra.mxu1 %v307_v1  ;;  %929 = vmatpush.msra.mxu3 %v307_v1  ;;  %v288_v6 = vld [vmem:[%s1381_s1 + $0x60] sm:$0xff]  ;;  %s1074_s13 = scalar_lea.vmem %s1383_s3, %s907_s8  ;;  %v287_v12 = vld [vmem:[%s1381_s1 + $0x58] sm:$0xff]  ;;  %v286_v14 = vld [vmem:[%s1381_s1 + $0x50] sm:$0xff]  ;;  %s1185_s24 = scalar_lea.vmem %s1380_s0, %s912_s11 }
   0xf   : > { %357 = vmatpush.msra.mxu0 %v290_v2  ;;  %914 = vmatpush.msra.mxu2 %v290_v2  ;;  %v304_v7 = vld [vmem:[%s1381_s1 + $0xe0] sm:$0xff]  ;;  %v1083_v10 = vld [vmem:[%s1074_s13 + $0x10] sm:$0xff]  ;;  %v303_v13 = vld [vmem:[%s1381_s1 + $0xd8] sm:$0xff]  ;;  %s1316_s7 = scalar_lea.vmem %s1384_s4, %s907_s8 }
  0x10   : > { %422 = vmatpush.msra.mxu1 %v306_v3  ;;  %930 = vmatpush.msra.mxu3 %v306_v3  ;;  %v1079_v9 = vld [vmem:[%s1074_s13 + $0x20] sm:$0xff]  ;;  %v302_v15 = vld [vmem:[%s1381_s1 + $0xd0] sm:$0xff]  ;;  %v285_v16 = vld [vmem:[%s1381_s1 + $0x48] sm:$0xff]  ;;  %vm687_vm4 = vcmp.gt.f32.partialorder %v1083_v10, 0.0 }
  0x11   : > { %358 = vmatpush.msra.mxu0 %v289_v4  ;;  %915 = vmatpush.msra.mxu2 %v289_v4  ;;  %v1086_v11 = vld [vmem:[%s1074_s13] sm:$0xff]  ;;  %v301_v17 = vld [vmem:[%s1381_s1 + $0xc8] sm:$0xff]  ;;  %v1119_v21 = vld [vmem:[%s1074_s13 + $0x18] sm:$0xff]  ;;  %vm689_vm2 = vcmp.gt.f32.partialorder %v1079_v9, 0.0  ;;  %v703_v1 = vsel %vm687_vm4, 1, %v998_v8 }
  0x12   : > { %423 = vmatpush.msra.mxu1 %v305_v5  ;;  %931 = vmatpush.msra.mxu3 %v305_v5  ;;  %v284_v18 = vld [vmem:[%s1381_s1 + $0x40] sm:$0xff]  ;;  %v1116_v20 = vld [vmem:[%s1074_s13 + $0x28] sm:$0xff]  ;;  %v283_v23 = vld [vmem:[%s1381_s1 + $0x38] sm:$0xff]  ;;  %vm685_vm0 = vcmp.gt.f32.partialorder %v1086_v11, 0.0  ;;  %vm688_vm3 = vcmp.gt.f32.partialorder %v1119_v21, 0.0  ;;  %v705_v63 = vsel %vm689_vm2, 1, %v998_v8 }
  0x13   : > { %972 = vset.pattern.permute.xlu2 %v998_v8  ;;  %971 = vset.pattern.permute.xlu1 %v998_v8  ;;  %v300_v19 = vld [vmem:[%s1381_s1 + $0xc0] sm:$0xff]  ;;  %v1122_v22 = vld [vmem:[%s1074_s13 + $0x8] sm:$0xff]  ;;  %v299_v24 = vld [vmem:[%s1381_s1 + $0xb8] sm:$0xff]  ;;  %v701_v57 = vsel %vm685_vm0, 1, %v998_v8  ;;  %v704_v0 = vsel %vm688_vm3, 1, %v998_v8  ;;  %vm690_vm7 = vcmp.gt.f32.partialorder %v1116_v20, 0.0 }
  0x14   : > { %970 = vset.pattern.permute.xlu0 %v998_v8  ;;  %359 = vmatpush.msra.mxu0 %v288_v6  ;;  %v282_v25 = vld [vmem:[%s1381_s1 + $0x30] sm:$0xff]  ;;  %v281_v27 = vld [vmem:[%s1381_s1 + $0x28] sm:$0xff]  ;;  %v280_v29 = vld [vmem:[%s1381_s1 + $0x20] sm:$0xff]  ;;  %vm686_vm1 = vcmp.gt.f32.partialorder %v1122_v22, 0.0 }
  0x15   : > { %916 = vmatpush.msra.mxu2 %v288_v6  ;;  %424 = vmatpush.msra.mxu1 %v304_v7  ;;  %v298_v26 = vld [vmem:[%s1381_s1 + $0xb0] sm:$0xff]  ;;  %v297_v28 = vld [vmem:[%s1381_s1 + $0xa8] sm:$0xff]  ;;  %v296_v30 = vld [vmem:[%s1381_s1 + $0xa0] sm:$0xff]  ;;  %v702_v56 = vsel %vm686_vm1, 1, %v998_v8 }
  0x16   : > { %932 = vmatpush.msra.mxu3 %v304_v7  ;;  %575 = vperm.xlu2 %972, %v1079_v9   ;;  %v1152_v31 = vld [vmem:[%s1074_s13 + $0x40] sm:$0xff]  ;;  %v1155_v32 = vld [vmem:[%s1074_s13 + $0x38] sm:$0xff]  ;;  %v1158_v33 = vld [vmem:[%s1074_s13 + $0x30] sm:$0xff]  ;;  %v706_v9 = vsel %vm690_vm7, 1, %v998_v8 }
  0x17   : > { %565 = vperm.xlu1 %971, %v1083_v10   ;;  %555 = vperm.xlu0 %970, %v1086_v11   ;;  %v279_v34 = vld [vmem:[%s1381_s1 + $0x18] sm:$0xff]  ;;  %v278_v36 = vld [vmem:[%s1381_s1 + $0x10] sm:$0xff]  ;;  %v277_v38 = vld [vmem:[%s1381_s1 + $0x8] sm:$0xff]  ;;  %vm692_vm5 = vcmp.gt.f32.partialorder %v1155_v32, 0.0  ;;  %vm691_vm6 = vcmp.gt.f32.partialorder %v1158_v33, 0.0  ;;  %vm693_vm10 = vcmp.gt.f32.partialorder %v1152_v31, 0.0 }
  0x18   : > { %360 = vmatpush.msra.mxu0 %v287_v12  ;;  %917 = vmatpush.msra.mxu2 %v287_v12  ;;  %v295_v35 = vld [vmem:[%s1381_s1 + $0x98] sm:$0xff]  ;;  %v294_v37 = vld [vmem:[%s1381_s1 + $0x90] sm:$0xff]  ;;  %v293_v39 = vld [vmem:[%s1381_s1 + $0x88] sm:$0xff]  ;;  %v708_v6 = vsel %vm692_vm5, 1, %v998_v8  ;;  %v707_v7 = vsel %vm691_vm6, 1, %v998_v8 }
  0x19   : > { %425 = vmatpush.msra.mxu1 %v303_v13  ;;  %933 = vmatpush.msra.mxu3 %v303_v13  ;;  %v276_v40 = vld [vmem:[%s1381_s1] sm:$0xff]  ;;  %v1194_v42 = vld [vmem:[%s1074_s13 + $0x58] sm:$0xff]  ;;  %v1197_v43 = vld [vmem:[%s1074_s13 + $0x50] sm:$0xff] }
  0x1a   : > { %361 = vmatpush.msra.mxu0 %v286_v14  ;;  %918 = vmatpush.msra.mxu2 %v286_v14  ;;  %v292_v41 = vld [vmem:[%s1381_s1 + $0x80] sm:$0xff]  ;;  %v1200_v44 = vld [vmem:[%s1074_s13 + $0x48] sm:$0xff]  ;;  %v1210_v49 = vld [vmem:[%s1074_s13 + $0x70] sm:$0xff]  ;;  %vm695_vm8 = vcmp.gt.f32.partialorder %v1197_v43, 0.0  ;;  %vm696_vm13 = vcmp.gt.f32.partialorder %v1194_v42, 0.0 }
  0x1b   : > { %426 = vmatpush.msra.mxu1 %v302_v15  ;;  %934 = vmatpush.msra.mxu3 %v302_v15  ;;  %v324_v45 = vld [vmem:[%s1185_s24] sm:$0xff]  ;;  %v325_v47 = vld [vmem:[%s1185_s24 + $0x8] sm:$0xff]  ;;  %v326_v52 = vld [vmem:[%s1185_s24 + $0x10] sm:$0xff]  ;;  %vm694_vm9 = vcmp.gt.f32.partialorder %v1200_v44, 0.0  ;;  %v711_v14 = vsel %vm695_vm8, 1, %v998_v8  ;;  %vm699_vm15 = vcmp.gt.f32.partialorder %v1210_v49, 0.0 }
  0x1c   : > { %362 = vmatpush.msra.mxu0 %v285_v16  ;;  %919 = vmatpush.msra.mxu2 %v285_v16  ;;  %v340_v46 = vld [vmem:[%s1185_s24 + $0x80] sm:$0xff]  ;;  %v341_v48 = vld [vmem:[%s1185_s24 + $0x88] sm:$0xff]  ;;  %v342_v53 = vld [vmem:[%s1185_s24 + $0x90] sm:$0xff]  ;;  %v710_v15 = vsel %vm694_vm9, 1, %v998_v8  ;;  %v709_v16 = vsel %vm693_vm10, 1, %v998_v8 }
  0x1d   : > { %427 = vmatpush.msra.mxu1 %v301_v17  ;;  %935 = vmatpush.msra.mxu3 %v301_v17  ;;  %v1213_v50 = vld [vmem:[%s1074_s13 + $0x68] sm:$0xff]  ;;  %v1216_v51 = vld [vmem:[%s1074_s13 + $0x60] sm:$0xff]  ;;  %v327_v54 = vld [vmem:[%s1185_s24 + $0x18] sm:$0xff] }
  0x1e   : > { %363 = vmatpush.msra.mxu0 %v284_v18  ;;  %920 = vmatpush.msra.mxu2 %v284_v18  ;;  %v343_v55 = vld [vmem:[%s1185_s24 + $0x98] sm:$0xff]  ;;  %v328_v59 = vld [vmem:[%s1185_s24 + $0x20] sm:$0xff]  ;;  %v329_v61 = vld [vmem:[%s1185_s24 + $0x28] sm:$0xff]  ;;  %vm698_vm11 = vcmp.gt.f32.partialorder %v1213_v50, 0.0  ;;  %vm697_vm12 = vcmp.gt.f32.partialorder %v1216_v51, 0.0 }
  0x1f   : > { %428 = vmatpush.msra.mxu1 %v300_v19  ;;  %936 = vmatpush.msra.mxu3 %v300_v19  ;;  %v1230_v58 = vld [vmem:[%s1074_s13 + $0x78] sm:$0xff]  ;;  %v344_v60 = vld [vmem:[%s1185_s24 + $0xa0] sm:$0xff]  ;;  %v345_v62 = vld [vmem:[%s1185_s24 + $0xa8] sm:$0xff] }
  0x20   : > { %580 = vperm.xlu2 %972, %v1116_v20   ;;  %570 = vperm.xlu1 %971, %v1119_v21   ;;  %v330_v2 = vld [vmem:[%s1185_s24 + $0x30] sm:$0xff]  ;;  %v331_v4 = vld [vmem:[%s1185_s24 + $0x38] sm:$0xff]  ;;  %v332_v10 = vld [vmem:[%s1185_s24 + $0x40] sm:$0xff]  ;;  %v714_v21 = vsel %vm698_vm11, 1, %v998_v8  ;;  %vm700_vm14 = vcmp.gt.f32.partialorder %v1230_v58, 0.0 }
  0x21   : > { %560 = vperm.xlu0 %970, %v1122_v22   ;;  %364 = vmatpush.msra.mxu0 %v283_v23  ;;  %v346_v3 = vld [vmem:[%s1185_s24 + $0xb0] sm:$0xff]  ;;  %v347_v5 = vld [vmem:[%s1185_s24 + $0xb8] sm:$0xff]  ;;  %v348_v11 = vld [vmem:[%s1185_s24 + $0xc0] sm:$0xff]  ;;  %v713_v22 = vsel %vm697_vm12, 1, %v998_v8 }
  0x22   : > { %921 = vmatpush.msra.mxu2 %v283_v23  ;;  %429 = vmatpush.msra.mxu1 %v299_v24  ;;  %v333_v12 = vld [vmem:[%s1185_s24 + $0x48] sm:$0xff]  ;;  %v334_v17 = vld [vmem:[%s1185_s24 + $0x50] sm:$0xff]  ;;  %v335_v19 = vld [vmem:[%s1185_s24 + $0x58] sm:$0xff]  ;;  %v712_v23 = vsel %vm696_vm13, 1, %v998_v8 }
  0x23   : > { %937 = vmatpush.msra.mxu3 %v299_v24  ;;  %365 = vmatpush.msra.mxu0 %v282_v25  ;;  %v349_v13 = vld [vmem:[%s1185_s24 + $0xc8] sm:$0xff]  ;;  %v350_v18 = vld [vmem:[%s1185_s24 + $0xd0] sm:$0xff]  ;;  %v351_v20 = vld [vmem:[%s1185_s24 + $0xd8] sm:$0xff] }
  0x24   : > { %922 = vmatpush.msra.mxu2 %v282_v25  ;;  %430 = vmatpush.msra.mxu1 %v298_v26  ;;  %v336_v24 = vld [vmem:[%s1185_s24 + $0x60] sm:$0xff] }
  0x25   : > { %938 = vmatpush.msra.mxu3 %v298_v26  ;;  %366 = vmatpush.msra.mxu0 %v281_v27  ;;  %v352_v25 = vld [vmem:[%s1185_s24 + $0xe0] sm:$0xff]  ;;  %v337_v26 = vld [vmem:[%s1185_s24 + $0x68] sm:$0xff] }
  0x26   : > { %923 = vmatpush.msra.mxu2 %v281_v27  ;;  %431 = vmatpush.msra.mxu1 %v297_v28  ;;  %v353_v27 = vld [vmem:[%s1185_s24 + $0xe8] sm:$0xff] }
  0x27   : > { %939 = vmatpush.msra.mxu3 %v297_v28  ;;  %367 = vmatpush.msra.mxu0 %v280_v29  ;;  %v716_v28 = vsel %vm700_vm14, 1, %v998_v8 }
  0x28   : > { %924 = vmatpush.msra.mxu2 %v280_v29  ;;  %432 = vmatpush.msra.mxu1 %v296_v30  ;;  %v715_v29 = vsel %vm699_vm15, 1, %v998_v8 }
  0x29   : > { %940 = vmatpush.msra.mxu3 %v296_v30  ;;  %595 = vperm.xlu2 %972, %v1152_v31   ;;  %v338_v30 = vld [vmem:[%s1185_s24 + $0x70] sm:$0xff] }
  0x2a   : > { %590 = vperm.xlu1 %971, %v1155_v32   ;;  %585 = vperm.xlu0 %970, %v1158_v33   ;;  %v354_v31 = vld [vmem:[%s1185_s24 + $0xf0] sm:$0xff]  ;;  %v339_v32 = vld [vmem:[%s1185_s24 + $0x78] sm:$0xff] }
  0x2b   : > { %368 = vmatpush.msra.mxu0 %v279_v34  ;;  %925 = vmatpush.msra.mxu2 %v279_v34  ;;  %v355_v33 = vld [vmem:[%s1185_s24 + $0xf8] sm:$0xff] }
  0x2c   : > { %433 = vmatpush.msra.mxu1 %v295_v35  ;;  %941 = vmatpush.msra.mxu3 %v295_v35 }
  0x2d   : > { %369 = vmatpush.msra.mxu0 %v278_v36  ;;  %926 = vmatpush.msra.mxu2 %v278_v36 }
  0x2e   : > { %434 = vmatpush.msra.mxu1 %v294_v37  ;;  %942 = vmatpush.msra.mxu3 %v294_v37 }
  0x2f   : > { %370 = vmatpush.msra.mxu0 %v277_v38  ;;  %927 = vmatpush.msra.mxu2 %v277_v38 }
  0x30   : > { %435 = vmatpush.msra.mxu1 %v293_v39  ;;  %943 = vmatpush.msra.mxu3 %v293_v39 }
  0x31   : > { %371 = vmatpush.msra.mxu0 %v276_v40  ;;  %928 = vmatpush.msra.mxu2 %v276_v40 }
  0x32   : > { %436 = vmatpush.msra.mxu1 %v292_v41  ;;  %944 = vmatpush.msra.mxu3 %v292_v41 }
  0x33   : > { %610 = vperm.xlu2 %972, %v1194_v42   ;;  %605 = vperm.xlu1 %971, %v1197_v43  }
  0x34   : > { %600 = vperm.xlu0 %970, %v1200_v44   ;;  %372 = vmatmul.f32.vlgmr.msra.gmra.mxu0 %v324_v45 }
  0x35   : > { %396 = vmatmul.f32.vlgmr.msra.gmra.mxu2 %v340_v46  ;;  %437 = vmatmul.f32.vlgmr.msra.gmra.mxu1 %v325_v47 }
  0x36   : > { %461 = vmatmul.f32.vlgmr.msra.gmra.mxu3 %v341_v48 }
  0x3b   : > { %625 = vperm.xlu2 %972, %v1210_v49   ;;  %620 = vperm.xlu1 %971, %v1213_v50  }
  0x3c   : > { %615 = vperm.xlu0 %970, %v1216_v51   ;;  %375 = vmatmul.f32.gmra.mxu0 %v326_v52  ;;  %v1306_v52 = vld [vmem:[%s1382_s2] ss:$0 sm:$0xff] }
  0x3d   : > { %399 = vmatmul.f32.gmra.mxu2 %v342_v53  ;;  %440 = vmatmul.f32.gmra.mxu1 %v327_v54 }
  0x3e   : > { %464 = vmatmul.f32.gmra.mxu3 %v343_v55 }
  0x43   : > { %721 = vperm.xlu2 %972, %v702_v56   ;;  %718 = vperm.xlu1 %971, %v701_v57  }
  0x44   : > { %630 = vperm.xlu0 %970, %v1230_v58   ;;  %378 = vmatmul.f32.gmra.mxu0 %v328_v59 }
  0x45   : > { %402 = vmatmul.f32.gmra.mxu2 %v344_v60  ;;  %443 = vmatmul.f32.gmra.mxu1 %v329_v61 }
  0x46   : > { %467 = vmatmul.f32.gmra.mxu3 %v345_v62 }
  0x4b   : > { %730 = vperm.xlu2 %972, %v705_v63   ;;  %727 = vperm.xlu1 %971, %v704_v0  }
  0x4c   : > { %724 = vperm.xlu0 %970, %v703_v1   ;;  %381 = vmatmul.f32.gmra.mxu0 %v330_v2 }
  0x4d   : > { %405 = vmatmul.f32.gmra.mxu2 %v346_v3  ;;  %446 = vmatmul.f32.gmra.mxu1 %v331_v4 }
  0x4e   : > { %470 = vmatmul.f32.gmra.mxu3 %v347_v5 }
  0x53   : > { %739 = vperm.xlu2 %972, %v708_v6   ;;  %736 = vperm.xlu1 %971, %v707_v7  }
  0x54   : > { %733 = vperm.xlu0 %970, %v706_v9   ;;  %384 = vmatmul.f32.gmra.mxu0 %v332_v10 }
  0x55   : > { %408 = vmatmul.f32.gmra.mxu2 %v348_v11  ;;  %449 = vmatmul.f32.gmra.mxu1 %v333_v12 }
  0x56   : > { %473 = vmatmul.f32.gmra.mxu3 %v349_v13 }
  0x5b   : > { %748 = vperm.xlu2 %972, %v711_v14   ;;  %745 = vperm.xlu1 %971, %v710_v15  }
  0x5c   : > { %742 = vperm.xlu0 %970, %v709_v16   ;;  %387 = vmatmul.f32.gmra.mxu0 %v334_v17 }
  0x5d   : > { %411 = vmatmul.f32.gmra.mxu2 %v350_v18  ;;  %452 = vmatmul.f32.gmra.mxu1 %v335_v19 }
  0x5e   : > { %476 = vmatmul.f32.gmra.mxu3 %v351_v20 }
  0x63   : > { %757 = vperm.xlu2 %972, %v714_v21   ;;  %754 = vperm.xlu1 %971, %v713_v22  }
  0x64   : > { %751 = vperm.xlu0 %970, %v712_v23   ;;  %390 = vmatmul.f32.gmra.mxu0 %v336_v24 }
  0x65   : > { %414 = vmatmul.f32.gmra.mxu2 %v352_v25  ;;  %455 = vmatmul.f32.gmra.mxu1 %v337_v26 }
  0x66   : > { %479 = vmatmul.f32.gmra.mxu3 %v353_v27 }
  0x6b   : > { %763 = vperm.xlu1 %971, %v716_v28  }
  0x6c   : > { %760 = vperm.xlu0 %970, %v715_v29   ;;  %393 = vmatmul.f32.gmra.mxu0 %v338_v30 }
  0x6d   : > { %417 = vmatmul.f32.gmra.mxu2 %v354_v31  ;;  %458 = vmatmul.f32.gmra.mxu1 %v339_v32 }
  0x6e   : > { %482 = vmatmul.f32.gmra.mxu3 %v355_v33 }
  0x70   : > { %v1285_v34 = vpop.permute.xlu2 %575 }
  0x7a   : > { %v1287_v35 = vpop.permute.xlu2 %580 }
  0x83   : > { %v596_v38 = vpop.permute.xlu2 %595 }
  0x89   : > { %v566_v36 = vpop.permute.xlu1 %565  ;;  %v556_v37 = vpop.permute.xlu0 %555 }
  0x8d   : > { %v1291_v40 = vpop.permute.xlu2 %610 }
  0x92   : > { %v1289_v39 = vpop.permute.xlu1 %570 }
  0x93   : > { %v561_v8 = vpop.permute.xlu0 %560 }
  0x95   : > { %v1297_v44 = vpop.permute.xlu2 %625 }
  0x9c   : > { %v1293_v41 = vpop.permute.xlu1 %590  ;;  %v1295_v42 = vpop.permute.xlu0 %585 }
  0x9d   : > { %v722_v48 = vpop.permute.xlu2 %721 }
  0x9e   : > { %vm766_vm1 = vcmp.eq.s32.totalorder %v722_v48, 1 }
  0xa5   : > { %v606_v43 = vpop.permute.xlu1 %605  ;;  %v1318_v61 = vpop.permute.xlu2 %730 }
  0xa6   : > { %v601_v45 = vpop.permute.xlu0 %600  ;;  %vm769_vm8 = vcmp.eq.s32.totalorder %v1318_v61, 1 }
  0xad   : > { %v1299_v46 = vpop.permute.xlu1 %620  ;;  %v1322_v15 = vpop.permute.xlu2 %739 }
  0xae   : > { %v1301_v47 = vpop.permute.xlu0 %615  ;;  %vm772_vm14 = vcmp.eq.s32.totalorder %v1322_v15, 1 }
  0xb1   : > { %v373_v49 = vpop.f32.mrf.mxu0 }
  0xb2   : > { %v438_v50 = vpop.f32.mrf.mxu1 }
  0xb3   : > { %v439_v51 = vadd.f32 %v438_v50, %v373_v49 }
  0xb5   : > { %v633_v53 = vmul.f32 %v556_v37, %v439_v51  ;;  %v719_v54 = vpop.permute.xlu1 %718 }
  0xb6   : > { %v1308_v55 = vpop.permute.xlu0 %630  ;;  %vm765_vm0 = vcmp.eq.s32.totalorder %v719_v54, 1 }
  0xb7   : > { %v653_v56 = vadd.f32 %v1306_v52, %v633_v53 }
  0xb8   : > { %v397_v57 = vpop.f32.mrf.mxu2 }
  0xb9   : > { %v669_v58 = vmax.f32 %v653_v56, 0.0  ;;  %v462_v59 = vpop.f32.mrf.mxu3  ;;  %v376_v60 = vpop.f32.mrf.mxu0 }
  0xba   : > { %v441_v62 = vpop.f32.mrf.mxu1  ;;  %v463_v10 = vadd.f32 %v462_v59, %v397_v57 }
  0xbb   : > { %v781_v63 = vsel %vm765_vm0, %v669_v58, 0.0  ;;  %v442_v0 = vadd.f32 %v441_v62, %v376_v60 }
  0xbc   : > { %797 = vst [vmem:[%s1316_s7] sm:$0xff] %v781_v63  ;;  %v641_v19 = vmul.f32 %v596_v38, %v463_v10  ;;  %v749_v38 = vpop.permute.xlu2 %748 }
  0xbd   : > { %v634_v1 = vmul.f32 %v561_v8, %v442_v0  ;;  %v728_v2 = vpop.permute.xlu1 %727  ;;  %vm775_vm5 = vcmp.eq.s32.totalorder %v749_v38, 1 }
  0xbe   : > { %v725_v3 = vpop.permute.xlu0 %724  ;;  %v661_v29 = vadd.f32 %v1306_v52, %v641_v19  ;;  %vm768_vm6 = vcmp.eq.s32.totalorder %v728_v2, 1 }
  0xbf   : > { %v654_v4 = vadd.f32 %v1306_v52, %v634_v1  ;;  %vm767_vm2 = vcmp.eq.s32.totalorder %v725_v3, 1 }
  0xc0   : > { %v400_v5 = vpop.f32.mrf.mxu2  ;;  %v677_v48 = vmax.f32 %v661_v29, 0.0 }
  0xc1   : > { %v670_v6 = vmax.f32 %v654_v4, 0.0  ;;  %v465_v7 = vpop.f32.mrf.mxu3  ;;  %v379_v9 = vpop.f32.mrf.mxu0 }
  0xc2   : > { %v466_v11 = vadd.f32 %v465_v7, %v400_v5  ;;  %v444_v12 = vpop.f32.mrf.mxu1 }
  0xc3   : > { %v782_v13 = vsel %vm766_vm1, %v670_v6, 0.0  ;;  %v445_v14 = vadd.f32 %v444_v12, %v379_v9 }
  0xc4   : > { %798 = vst [vmem:[%s1316_s7 + $0x8] sm:$0xff] %v782_v13  ;;  %v642_v16 = vmul.f32 %v601_v45, %v466_v11 }
  0xc5   : > { %v635_v17 = vmul.f32 %v566_v36, %v445_v14  ;;  %v1325_v18 = vpop.permute.xlu1 %736 }
  0xc6   : > { %v1327_v20 = vpop.permute.xlu0 %733  ;;  %v662_v26 = vadd.f32 %v1306_v52, %v642_v16  ;;  %vm771_vm12 = vcmp.eq.s32.totalorder %v1325_v18, 1 }
  0xc7   : > { %v655_v21 = vadd.f32 %v1306_v52, %v635_v17  ;;  %vm770_vm10 = vcmp.eq.s32.totalorder %v1327_v20, 1 }
  0xc8   : > { %v403_v22 = vpop.f32.mrf.mxu2  ;;  %v678_v37 = vmax.f32 %v662_v26, 0.0 }
  0xc9   : > { %v671_v23 = vmax.f32 %v655_v21, 0.0  ;;  %v468_v24 = vpop.f32.mrf.mxu3  ;;  %v382_v25 = vpop.f32.mrf.mxu0 }
  0xca   : > { %v469_v27 = vadd.f32 %v468_v24, %v403_v22  ;;  %v447_v28 = vpop.f32.mrf.mxu1 }
  0xcb   : > { %v783_v30 = vsel %vm767_vm2, %v671_v23, 0.0  ;;  %v448_v31 = vadd.f32 %v447_v28, %v382_v25 }
  0xcc   : > { %799 = vst [vmem:[%s1316_s7 + $0x10] sm:$0xff] %v783_v30  ;;  %v643_v32 = vmul.f32 %v606_v43, %v469_v27  ;;  %v758_v30 = vpop.permute.xlu2 %757 }
  0xcd   : > { %v636_v33 = vmul.f32 %v1289_v39, %v448_v31  ;;  %v746_v36 = vpop.permute.xlu1 %745  ;;  %vm778_vm11 = vcmp.eq.s32.totalorder %v758_v30, 1 }
  0xce   : > { %v663_v8 = vadd.f32 %v1306_v52, %v643_v32  ;;  %v743_v45 = vpop.permute.xlu0 %742  ;;  %vm774_vm3 = vcmp.eq.s32.totalorder %v746_v36, 1 }
  0xcf   : > { %v656_v49 = vadd.f32 %v1306_v52, %v636_v33  ;;  %vm773_vm4 = vcmp.eq.s32.totalorder %v743_v45, 1  ;;  %v790_v50 = vsel %vm774_vm3, %v678_v37, 0.0 }
  0xd0   : > { %v679_v51 = vmax.f32 %v663_v8, 0.0  ;;  %v789_v53 = vsel %vm773_vm4, %v677_v48, 0.0  ;;  %806 = vst [vmem:[%s1316_s7 + $0x48] sm:$0xff] %v790_v50  ;;  %v406_v43 = vpop.f32.mrf.mxu2 }
  0xd1   : > { %v672_v39 = vmax.f32 %v656_v49, 0.0  ;;  %805 = vst [vmem:[%s1316_s7 + $0x40] sm:$0xff] %v789_v53  ;;  %v471_v54 = vpop.f32.mrf.mxu3  ;;  %v385_v56 = vpop.f32.mrf.mxu0 }
  0xd2   : > { %v791_v57 = vsel %vm775_vm5, %v679_v51, 0.0  ;;  %v472_v58 = vadd.f32 %v471_v54, %v406_v43  ;;  %v450_v59 = vpop.f32.mrf.mxu1 }
  0xd3   : > { %807 = vst [vmem:[%s1316_s7 + $0x50] sm:$0xff] %v791_v57  ;;  %v784_v60 = vsel %vm768_vm6, %v672_v39, 0.0  ;;  %v451_v62 = vadd.f32 %v450_v59, %v385_v56 }
  0xd4   : > { %800 = vst [vmem:[%s1316_s7 + $0x18] sm:$0xff] %v784_v60  ;;  %v644_v63 = vmul.f32 %v1291_v40, %v472_v58 }
  0xd5   : > { %v637_v0 = vmul.f32 %v1285_v34, %v451_v62  ;;  %v755_v16 = vpop.permute.xlu1 %754 }
  0xd6   : > { %v752_v1 = vpop.permute.xlu0 %751  ;;  %v664_v3 = vadd.f32 %v1306_v52, %v644_v63  ;;  %vm777_vm9 = vcmp.eq.s32.totalorder %v755_v16, 1 }
  0xd7   : > { %v657_v4 = vadd.f32 %v1306_v52, %v637_v0  ;;  %vm776_vm7 = vcmp.eq.s32.totalorder %v752_v1, 1 }
  0xd8   : > { %v680_v2 = vmax.f32 %v664_v3, 0.0  ;;  %v409_v5 = vpop.f32.mrf.mxu2 }
  0xd9   : > { %v673_v6 = vmax.f32 %v657_v4, 0.0  ;;  %v474_v7 = vpop.f32.mrf.mxu3  ;;  %v388_v9 = vpop.f32.mrf.mxu0 }
  0xda   : > { %v792_v10 = vsel %vm776_vm7, %v680_v2, 0.0  ;;  %v475_v11 = vadd.f32 %v474_v7, %v409_v5  ;;  %v453_v40 = vpop.f32.mrf.mxu1 }
  0xdb   : > { %v785_v12 = vsel %vm769_vm8, %v673_v6, 0.0  ;;  %808 = vst [vmem:[%s1316_s7 + $0x58] sm:$0xff] %v792_v10  ;;  %v454_v34 = vadd.f32 %v453_v40, %v388_v9 }
  0xdc   : > { %801 = vst [vmem:[%s1316_s7 + $0x20] sm:$0xff] %v785_v12  ;;  %v645_v13 = vmul.f32 %v1301_v47, %v475_v11 }
  0xdd   : > { %v638_v14 = vmul.f32 %v1287_v35, %v454_v34 }
  0xde   : > { %v665_v17 = vadd.f32 %v1306_v52, %v645_v13  ;;  %v761_v51 = vpop.permute.xlu0 %760 }
  0xdf   : > { %v658_v19 = vadd.f32 %v1306_v52, %v638_v14  ;;  %vm779_vm13 = vcmp.eq.s32.totalorder %v761_v51, 1 }
  0xe0   : > { %v681_v21 = vmax.f32 %v665_v17, 0.0  ;;  %v412_v61 = vpop.f32.mrf.mxu2 }
  0xe1   : > { %v674_v22 = vmax.f32 %v658_v19, 0.0  ;;  %v477_v23 = vpop.f32.mrf.mxu3  ;;  %v391_v24 = vpop.f32.mrf.mxu0 }
  0xe2   : > { %v793_v25 = vsel %vm777_vm9, %v681_v21, 0.0  ;;  %v478_v26 = vadd.f32 %v477_v23, %v412_v61  ;;  %v456_v27 = vpop.f32.mrf.mxu1 }
  0xe3   : > { %809 = vst [vmem:[%s1316_s7 + $0x60] sm:$0xff] %v793_v25  ;;  %v786_v47 = vsel %vm770_vm10, %v674_v22, 0.0  ;;  %v457_v35 = vadd.f32 %v456_v27, %v391_v24 }
  0xe4   : > { %802 = vst [vmem:[%s1316_s7 + $0x28] sm:$0xff] %v786_v47  ;;  %v646_v28 = vmul.f32 %v1299_v46, %v478_v26 }
  0xe5   : > { %v639_v29 = vmul.f32 %v1295_v42, %v457_v35 }
  0xe6   : > { %v666_v31 = vadd.f32 %v1306_v52, %v646_v28 }
  0xe7   : > { %v659_v32 = vadd.f32 %v1306_v52, %v639_v29 }
  0xe8   : > { %v682_v33 = vmax.f32 %v666_v31, 0.0  ;;  %v415_v20 = vpop.f32.mrf.mxu2 }
  0xe9   : > { %v675_v36 = vmax.f32 %v659_v32, 0.0  ;;  %v480_v37 = vpop.f32.mrf.mxu3  ;;  %v394_v38 = vpop.f32.mrf.mxu0 }
  0xea   : > { %v794_v8 = vsel %vm778_vm11, %v682_v33, 0.0  ;;  %v481_v45 = vadd.f32 %v480_v37, %v415_v20  ;;  %v459_v48 = vpop.f32.mrf.mxu1 }
  0xeb   : > { %810 = vst [vmem:[%s1316_s7 + $0x68] sm:$0xff] %v794_v8  ;;  %v787_v46 = vsel %vm771_vm12, %v675_v36, 0.0  ;;  %v460_v42 = vadd.f32 %v459_v48, %v394_v38 }
  0xec   : > { %803 = vst [vmem:[%s1316_s7 + $0x30] sm:$0xff] %v787_v46  ;;  %v647_v49 = vmul.f32 %v1297_v44, %v481_v45  ;;  %v764_v44 = vpop.permute.xlu1 %763 }
  0xed   : > { %v640_v50 = vmul.f32 %v1293_v41, %v460_v42  ;;  %vm780_vm15 = vcmp.eq.s32.totalorder %v764_v44, 1 }
  0xee   : > { %v667_v53 = vadd.f32 %v1306_v52, %v647_v49 }
  0xef   : > { %v660_v43 = vadd.f32 %v1306_v52, %v640_v50 }
  0xf0   : > { %v683_v39 = vmax.f32 %v667_v53, 0.0  ;;  %v418_v18 = vpop.f32.mrf.mxu2 }
  0xf1   : > { %v676_v54 = vmax.f32 %v660_v43, 0.0  ;;  %v483_v56 = vpop.f32.mrf.mxu3 }
  0xf2   : > { %v795_v57 = vsel %vm779_vm13, %v683_v39, 0.0  ;;  %v484_v58 = vadd.f32 %v483_v56, %v418_v18 }
  0xf3   : > { %811 = vst [vmem:[%s1316_s7 + $0x70] sm:$0xff] %v795_v57  ;;  %v788_v59 = vsel %vm772_vm14, %v676_v54, 0.0 }
  0xf4   : > { %804 = vst [vmem:[%s1316_s7 + $0x38] sm:$0xff] %v788_v59  ;;  %v648_v41 = vmul.f32 %v1308_v55, %v484_v58 }
  0xf6   : > { %v668_v60 = vadd.f32 %v1306_v52, %v648_v41 }
  0xf8   : > { %v684_v62 = vmax.f32 %v668_v60, 0.0 }
  0xfa   : > { %v796_v63 = vsel %vm780_vm15, %v684_v62, 0.0 }
  0xfb   : > { %812 = vst [vmem:[%s1316_s7 + $0x78] sm:$0xff] %v796_v63 }
  0xfc PF: > { %s14_s17 = sadd.s32 1, %s996_s17   ;;  %s1385_s15 = smov %s992_s16 }
  0xfd   : > { %p11_p5 = scmp.ge.s32.totalorder %s14_s17, 4   ;;  %s1386_s16 = smov %s1388_s18 }
  0xff   :  { %13 = sbr.rel (!%p11_p5) target bundleno = 2 (0x2), region = 78 }

</bundles_post_ra>
